<compile_context>
chip_gen: v7x
topology: tpu7x:2x2x1
jax: 0.10.0
libtpu: 0.0.40
codegen_flags: <defaults>
</compile_context>

<pallas_src>
import jax
import jax.numpy as jnp
import numpy as np
from jax import lax
from jax.experimental import pallas as pl
from jax.experimental.pallas import tpu as pltpu

BN_EPS = 1e-5
DILATIONS = (3, 6, 12, 18, 24)


# ------------------------- fused Pallas kernel -------------------------

def _make_kernel(cin, cmid, cout, h, w, dilations, maxs, bs):
    hw = h * w
    hwpad = 2 * maxs + hw
    L = bs * hw                      # lanes per grid step (bs images folded)
    nb = len(dilations)
    ctot = cin + nb * cout

    def kernel(s1_ref, t1_ref, w1_ref, b1_ref, w2_ref, b2_ref, x_ref, o_ref, pad_ref):
        # Zero ONLY the halo columns of the padded row buffer (center columns are fully
        # overwritten by every branch).  Not gated on program_id: under "parallel"
        # semantics each TensorCore owns its own scratch copy.
        for img in range(bs):
            base = img * hwpad
            pad_ref[:, base:base + maxs] = jnp.zeros((cmid, maxs), jnp.float32)
            pad_ref[:, base + maxs + hw:base + hwpad] = jnp.zeros((cmid, maxs), jnp.float32)

        # Column coordinate of every flattened spatial position (per-image lane offset is
        # a multiple of hw, hence of w, so one modulo covers the folded batch).
        col = lax.broadcasted_iota(jnp.int32, (1, L), 1) % w

        # Seed the resident output block with the input features (tail channels of the
        # torch.cat chain).  Branch i reads the contiguous suffix [(nb-i)*cout : ctot)
        # and writes its output to [(nb-1-i)*cout : (nb-i)*cout)  -> no concatenations.
        o_ref[nb * cout:ctot, :] = x_ref[...]

        for i, d in enumerate(dilations):
            cin_i = cin + i * cout
            inp = o_ref[(nb - i) * cout:ctot, :]                       # (cin_i, L) f32

            # [BN1 folded to scale/shift; identity on the first branch] + ReLU
            if i == 0:
                y = jnp.maximum(inp, 0.0)
            else:
                y = jnp.maximum(inp * s1_ref[i, :cin_i, :] + t1_ref[i, :cin_i, :], 0.0)

            # 1x1 conv (BN2 already folded into w1/b1) + ReLU  ->  (cmid, L)
            mid = jnp.dot(w1_ref[i, :, :cin_i], y.astype(jnp.bfloat16),
                          preferred_element_type=jnp.float32) + b1_ref[i]
            mid = jnp.maximum(mid, 0.0)

            # ---- 3x3 dilated conv ----
            if d >= h and d >= w:
                # Every off-center tap lies entirely in the zero padding: statically
                # reduce to the center tap -> single K=cmid matmul, no pad-buffer work.
                out = jnp.dot(w2_ref[i, :, 4 * cmid:5 * cmid], mid.astype(jnp.bfloat16),
                              preferred_element_type=jnp.float32) + b2_ref[i]
            else:
                # Write mid once into the zero-padded per-image row buffer, read the 9
                # dilated taps as static slices (out-of-row columns masked), concatenate
                # in f32, cast ONCE to bf16, and do one K = 9*cmid matmul.
                for img in range(bs):
                    base = img * hwpad
                    pad_ref[:, base + maxs:base + maxs + hw] = mid[:, img * hw:(img + 1) * hw]

                # Hoisted per-branch width masks, shared by all three ky rows.
                mask_pos = (col + d) < w if d < w else None            # dx = +d
                mask_neg = col >= d if d < w else None                 # dx = -d

                taps = []
                for ky in range(3):
                    dy = (ky - 1) * d
                    row_dead = (ky != 1) and (abs(dy) >= h)
                    for kx in range(3):
                        dx = (kx - 1) * d
                        col_dead = (kx != 1) and (abs(dx) >= w)
                        if row_dead or col_dead:                       # statically zero tap
                            taps.append(jnp.zeros((cmid, L), jnp.float32))
                            continue
                        s0 = maxs + dy * w + dx
                        pieces = [pad_ref[:, img * hwpad + s0:img * hwpad + s0 + hw]
                                  for img in range(bs)]
                        tap = pieces[0] if bs == 1 else jnp.concatenate(pieces, axis=1)
                        if dx > 0:
                            tap = jnp.where(mask_pos, tap, 0.0)
                        elif dx < 0:
                            tap = jnp.where(mask_neg, tap, 0.0)
                        taps.append(tap)                               # (cmid, L) f32
                tapcat = jnp.concatenate(taps, axis=0).astype(jnp.bfloat16)   # one bulk cast
                out = jnp.dot(w2_ref[i], tapcat,
                              preferred_element_type=jnp.float32) + b2_ref[i]

            # TODO(synk): training-mode dropout(p=0.1) omitted; eval-mode forward is identity.
            o_ref[(nb - 1 - i) * cout:(nb - i) * cout, :] = out        # (cout, L)

    return kernel


# ------------------------- wrapper (glue) -------------------------

def _stack_params(params_list, cin, cmid, cout):
    """Fold BN2 into the 1x1 conv and stack per-branch params (channel-padded to cmax)."""
    nb = len(params_list)
    cmax = cin + (nb - 1) * cout

    def padc(v, c):                      # pad the (last) channel axis up to cmax
        return jnp.pad(v, [(0, 0)] * (v.ndim - 1) + [(0, c)])

    s1_all = jnp.stack([padc(p["s1"], cmax - p["s1"].shape[0]) for p in params_list])[..., None]
    t1_all = jnp.stack([padc(p["t1"], cmax - p["t1"].shape[0]) for p in params_list])[..., None]
    # BN2 fold:  s2*(W1 x + b1) + t2  ==  (s2*W1) x + (s2*b1 + t2)
    w1f_all = jnp.stack([padc(p["s2"][:, None] * p["w1"], cmax - p["w1"].shape[1])
                         for p in params_list]).astype(jnp.bfloat16)        # (nb, cmid, cmax)
    b1f_all = jnp.stack([p["s2"] * p["b1"] + p["t2"] for p in params_list])[..., None]
    # OIHW (cout, cmid, 3, 3) -> (cout, 9*cmid) with column index (ky*3+kx)*cmid + cm
    w2f_all = jnp.stack([jnp.transpose(p["w2"], (0, 2, 3, 1)).reshape(cout, 9 * cmid)
                         for p in params_list]).astype(jnp.bfloat16)        # (nb, cout, 9*cmid)
    b2_all = jnp.stack([p["b2"] for p in params_list])[..., None]
    return s1_all, t1_all, w1f_all, b1f_all, w2f_all, b2_all


def dense_aspp_block(x_nchw, params_list):
    n, cin, h, w = x_nchw.shape
    hw = h * w
    nb = len(params_list)
    cmid = params_list[0]["w1"].shape[0]
    cout = params_list[0]["w2"].shape[0]
    ctot = cin + nb * cout
    cmax = cin + (nb - 1) * cout

    s1_all, t1_all, w1f_all, b1f_all, w2f_all, b2_all = _stack_params(
        params_list, cin, cmid, cout)

    # Images per grid step: fold the whole batch on single-TC chips (v5e/v6e) for full
    # lane occupancy and one grid step; one image per step + "parallel" on v7x so both
    # TensorCores get work.  (Heuristic on device_kind; affects perf only.)
    kind = str(getattr(jax.devices()[0], "device_kind", ""))
    bs = 1 if ("7" in kind and n > 1) else n
    L = bs * hw

    # Pad-row-buffer geometry: only the dilations that take the 9-tap path need halo;
    # center store stays lane-aligned (maxs, hwpad multiples of 128 for these shapes).
    full_ds = [d for d in DILATIONS if not (d >= h and d >= w)]
    max_shift = max([d * w + d for d in full_ds], default=0)
    maxs = max(128, ((max_shift + 127) // 128) * 128)
    hwpad = 2 * maxs + hw

    kernel = _make_kernel(cin, cmid, cout, h, w, DILATIONS, maxs, bs)

    # NCHW -> channels-first with images folded onto the lane axis: (C, N*H*W)
    x2 = jnp.transpose(x_nchw.reshape(n, cin, hw), (1, 0, 2)).reshape(cin, n * hw)

    # Advisory cost estimate (keeps XLA from mis-scheduling this us-scale call).
    flops = 0
    for i, d in enumerate(DILATIONS):
        cin_i = cin + i * cout
        k2 = cmid if (d >= h and d >= w) else 9 * cmid
        flops += 2 * cmid * cin_i * hw + 2 * cout * k2 * hw
    flops *= n
    param_bytes = sum(int(a.size) * a.dtype.itemsize
                      for a in (s1_all, t1_all, w1f_all, b1f_all, w2f_all, b2_all))
    bytes_accessed = int(x2.size) * 4 + n * ctot * hw * 4 + param_bytes

    out2 = pl.pallas_call(
        kernel,
        out_shape=jax.ShapeDtypeStruct((ctot, n * hw), jnp.float32),
        grid=(n // bs,),
        in_specs=[
            pl.BlockSpec((nb, cmax, 1), lambda b: (0, 0, 0)),        # BN1 scale
            pl.BlockSpec((nb, cmax, 1), lambda b: (0, 0, 0)),        # BN1 shift
            pl.BlockSpec((nb, cmid, cmax), lambda b: (0, 0, 0)),     # 1x1 conv (BN2-folded, bf16)
            pl.BlockSpec((nb, cmid, 1), lambda b: (0, 0, 0)),        # 1x1 conv bias (folded)
            pl.BlockSpec((nb, cout, 9 * cmid), lambda b: (0, 0, 0)), # 3x3 conv (bf16, K-concat)
            pl.BlockSpec((nb, cout, 1), lambda b: (0, 0, 0)),        # 3x3 conv bias
            pl.BlockSpec((cin, L), lambda b: (0, b)),                # input features
        ],
        out_specs=pl.BlockSpec((ctot, L), lambda b: (0, b)),         # resident dense-feature slab
        scratch_shapes=[pltpu.VMEM((cmid, bs * hwpad), jnp.float32)],  # zero-padded row buffer
        compiler_params=pltpu.CompilerParams(
            dimension_semantics=("parallel",)),
        cost_estimate=pl.CostEstimate(flops=flops, transcendentals=0,
                                      bytes_accessed=bytes_accessed),
    )(s1_all, t1_all, w1f_all, b1f_all, w2f_all, b2_all, x2)

    # (C, N*H*W) -> NCHW
    return jnp.transpose(out2.reshape(ctot, n, hw), (1, 0, 2)).reshape(n, ctot, h, w)


# ------------------------- parameter init (deterministic, synthetic) -------------------------

def _bn_affine(kg, kb, km, kv, c):
    gamma = jax.random.uniform(kg, (c,), jnp.float32, 0.5, 1.5)
    beta = 0.1 * jax.random.normal(kb, (c,), jnp.float32)
    mean = 0.1 * jax.random.normal(km, (c,), jnp.float32)
    var = jax.random.uniform(kv, (c,), jnp.float32, 0.5, 1.5)
    scale = gamma / jnp.sqrt(var + BN_EPS)               # eval-mode BN folded to scale/shift
    shift = beta - mean * scale
    return scale, shift


def make_branch_params(key, cin, cmid, cout, bn_start):
    ks = jax.random.split(key, 12)
    if bn_start:
        s1, t1 = _bn_affine(ks[0], ks[1], ks[2], ks[3], cin)
    else:
        s1, t1 = jnp.ones((cin,), jnp.float32), jnp.zeros((cin,), jnp.float32)
    w1 = 0.2 * jax.random.normal(ks[4], (cmid, cin), jnp.float32)       # 1x1 conv (Cmid, Cin)
    b1 = 0.1 * jax.random.normal(ks[5], (cmid,), jnp.float32)
    s2, t2 = _bn_affine(ks[6], ks[7], ks[8], ks[9], cmid)
    w2 = 0.1 * jax.random.normal(ks[10], (cout, cmid, 3, 3), jnp.float32)  # OIHW
    b2 = 0.1 * jax.random.normal(ks[11], (cout,), jnp.float32)
    return dict(s1=s1, t1=t1, w1=w1, b1=b1, s2=s2, t2=t2, w2=w2, b2=b2)


# ------------------------- pure-JAX reference -------------------------

def _ref_branch(x, p, d):
    y = jnp.maximum(x * p["s1"] + p["t1"], 0.0)
    z = jnp.einsum("nhwc,mc->nhwm", y, p["w1"],
                   precision=lax.Precision.HIGHEST) + p["b1"]
    z = jnp.maximum(z * p["s2"] + p["t2"], 0.0)
    out = lax.conv_general_dilated(
        z, p["w2"], window_strides=(1, 1), padding=[(d, d), (d, d)],
        rhs_dilation=(d, d), dimension_numbers=("NHWC", "OIHW", "NHWC"),
        precision=lax.Precision.HIGHEST) + p["b2"]
    return out


def _ref_block(x_nchw, params_list):
    x = jnp.transpose(x_nchw, (0, 2, 3, 1))
    for p, d in zip(params_list, DILATIONS):
        x = jnp.concatenate([_ref_branch(x, p, d), x], axis=-1)
    return jnp.transpose(x, (0, 3, 1, 2))


# ------------------------- main -------------------------

if __name__ == "__main__":
    key = jax.random.PRNGKey(0)
    n, cin, h, w = 2, 4, 16, 16
    cmid, cout = 8, 4

    k_x, k_p = jax.random.split(key)
    x = jax.random.normal(k_x, (n, cin, h, w), jnp.float32)   # PyTorch-style NCHW input

    branch_cins = [cin + i * cout for i in range(5)]          # dense channel growth
    bkeys = jax.random.split(k_p, 5)
    params = [make_branch_params(bkeys[i], branch_cins[i], cmid, cout,
                                 bn_start=(i != 0))
              for i in range(5)]

    out = jax.jit(dense_aspp_block)(x, params)
    out = jax.block_until_ready(out)

    assert out.shape == (n, cin + 5 * cout, h, w), out.shape
    ref = _ref_block(x, params)
    # bf16 MXU operands (f32 accumulation) vs f32 HIGHEST reference.
    np.testing.assert_allclose(np.asarray(out), np.asarray(ref), rtol=3e-2, atol=3e-2)

    print("KERNEL_OK")
</pallas_src>

<mosaic_0001>
module attributes {stable_mosaic.version = 11 : i64} {
  func.func @kernel(%arg0: i32, %arg1: memref<5x20x1xf32, #tpu.memory_space<vmem>>, %arg2: memref<5x20x1xf32, #tpu.memory_space<vmem>>, %arg3: memref<5x8x20xbf16, #tpu.memory_space<vmem>>, %arg4: memref<5x8x1xf32, #tpu.memory_space<vmem>>, %arg5: memref<5x4x72xbf16, #tpu.memory_space<vmem>>, %arg6: memref<5x4x1xf32, #tpu.memory_space<vmem>>, %arg7: memref<4x512xf32, #tpu.memory_space<vmem>>, %arg8: memref<24x512xf32, #tpu.memory_space<vmem>>, %arg9: memref<8x1536xf32, #tpu.memory_space<vmem>>) attributes {dimension_semantics = [#tpu.dimension_semantics<parallel>], iteration_bounds = array<i64: 1>, scalar_prefetch = 0 : i64, scratch_operands = 1 : i64, tpu.core_type = #tpu.core_type<tc>, window_params = [{pipeline_mode = #tpu.pipeline_mode<synchronous>, transform_indices = @transform_0, window_bounds = array<i64: 5, 20, 1>}, {pipeline_mode = #tpu.pipeline_mode<synchronous>, transform_indices = @transform_1, window_bounds = array<i64: 5, 20, 1>}, {pipeline_mode = #tpu.pipeline_mode<synchronous>, transform_indices = @transform_2, window_bounds = array<i64: 5, 8, 20>}, {pipeline_mode = #tpu.pipeline_mode<synchronous>, transform_indices = @transform_3, window_bounds = array<i64: 5, 8, 1>}, {pipeline_mode = #tpu.pipeline_mode<synchronous>, transform_indices = @transform_4, window_bounds = array<i64: 5, 4, 72>}, {pipeline_mode = #tpu.pipeline_mode<synchronous>, transform_indices = @transform_5, window_bounds = array<i64: 5, 4, 1>}, {transform_indices = @transform_6, window_bounds = array<i64: 4, 512>}, {transform_indices = @transform_7, window_bounds = array<i64: 24, 512>}]} {
    %cst = arith.constant 0.000000e+00 : f32
    %0 = vector.broadcast %cst : f32 to vector<8x256xf32>
    %c0 = arith.constant 0 : index
    %c0_0 = arith.constant 0 : index
    %1 = vector.load %arg9[%c0, %c0_0] : memref<8x1536xf32, #tpu.memory_space<vmem>>, vector<8x256xf32>
    tpu.vector_store %arg9[%c0, %c0_0], %0 {strides = array<i32>} : memref<8x1536xf32, #tpu.memory_space<vmem>>, vector<8x256xf32>,
    %cst_1 = arith.constant 0.000000e+00 : f32
    %2 = vector.broadcast %cst_1 : f32 to vector<8x256xf32>
    %c0_2 = arith.constant 0 : index
    %c512 = arith.constant 512 : index
    %3 = vector.load %arg9[%c0_2, %c512] : memref<8x1536xf32, #tpu.memory_space<vmem>>, vector<8x256xf32>
    tpu.vector_store %arg9[%c0_2, %c512], %2 {strides = array<i32>} : memref<8x1536xf32, #tpu.memory_space<vmem>>, vector<8x256xf32>,
    %cst_3 = arith.constant 0.000000e+00 : f32
    %4 = vector.broadcast %cst_3 : f32 to vector<8x256xf32>
    %c0_4 = arith.constant 0 : index
    %c768 = arith.constant 768 : index
    %5 = vector.load %arg9[%c0_4, %c768] : memref<8x1536xf32, #tpu.memory_space<vmem>>, vector<8x256xf32>
    tpu.vector_store %arg9[%c0_4, %c768], %4 {strides = array<i32>} : memref<8x1536xf32, #tpu.memory_space<vmem>>, vector<8x256xf32>,
    %cst_5 = arith.constant 0.000000e+00 : f32
    %6 = vector.broadcast %cst_5 : f32 to vector<8x256xf32>
    %c0_6 = arith.constant 0 : index
    %c1280 = arith.constant 1280 : index
    %7 = vector.load %arg9[%c0_6, %c1280] : memref<8x1536xf32, #tpu.memory_space<vmem>>, vector<8x256xf32>
    tpu.vector_store %arg9[%c0_6, %c1280], %6 {strides = array<i32>} : memref<8x1536xf32, #tpu.memory_space<vmem>>, vector<8x256xf32>,
    %8 = tpu.iota {dimensions = array<i32: 1>} : vector<1x512xi32>
    %c16_i32 = arith.constant 16 : i32
    %c0_i32 = arith.constant 0 : i32
    %9 = arith.cmpi eq, %c16_i32, %c0_i32 : i32
    %c1_i32 = arith.constant 1 : i32
    %10 = arith.select %9, %c1_i32, %c16_i32 : i32
    %11 = vector.broadcast %10 : i32 to vector<1x512xi32>
    %12 = arith.remsi %8, %11 : vector<1x512xi32>
    %c0_i32_7 = arith.constant 0 : i32
    %13 = vector.broadcast %c0_i32_7 : i32 to vector<1x512xi32>
    %14 = arith.cmpi ne, %12, %13 : vector<1x512xi32>
    %c0_i32_8 = arith.constant 0 : i32
    %15 = vector.broadcast %c0_i32_8 : i32 to vector<1x512xi32>
    %16 = arith.cmpi slt, %12, %15 : vector<1x512xi32>
    %c0_i32_9 = arith.constant 0 : i32
    %17 = arith.cmpi slt, %10, %c0_i32_9 : i32
    %18 = vector.broadcast %17 : i1 to vector<1x512xi1>
    %19 = vector.broadcast %18 : vector<1x512xi1> to vector<1x512xi1>
    %20 = arith.xori %16, %19 : vector<1x512xi1>
    %21 = arith.andi %20, %14 : vector<1x512xi1>
    %22 = vector.broadcast %10 : i32 to vector<1x512xi32>
    %23 = arith.addi %12, %22 : vector<1x512xi32>
    %24 = arith.select %21, %23, %12 : vector<1x512xi1>, vector<1x512xi32>
    %c0_10 = arith.constant 0 : index
    %c0_11 = arith.constant 0 : index
    %25 = vector.load %arg7[%c0_10, %c0_11] : memref<4x512xf32, #tpu.memory_space<vmem>>, vector<4x512xf32>
    %c20 = arith.constant 20 : index
    %c0_12 = arith.constant 0 : index
    %26 = vector.load %arg8[%c20, %c0_12] : memref<24x512xf32, #tpu.memory_space<vmem>>, vector<4x512xf32>
    tpu.vector_store %arg8[%c20, %c0_12], %25 {strides = array<i32>} : memref<24x512xf32, #tpu.memory_space<vmem>>, vector<4x512xf32>,
    %c20_13 = arith.constant 20 : index
    %c0_14 = arith.constant 0 : index
    %27 = vector.load %arg8[%c20_13, %c0_14] : memref<24x512xf32, #tpu.memory_space<vmem>>, vector<4x512xf32>
    %cst_15 = arith.constant 0.000000e+00 : f32
    %28 = vector.broadcast %cst_15 : f32 to vector<4x512xf32>
    %29 = arith.maximumf %27, %28 : vector<4x512xf32>
    %c0_16 = arith.constant 0 : index
    %c0_17 = arith.constant 0 : index
    %c0_18 = arith.constant 0 : index
    %30 = vector.load %arg3[%c0_16, %c0_17, %c0_18] : memref<5x8x20xbf16, #tpu.memory_space<vmem>>, vector<1x8x4xbf16>
    %31 = vector.shape_cast %30 : vector<1x8x4xbf16> to vector<8x4xbf16>
    %32 = arith.truncf %29 : vector<4x512xf32> to vector<4x512xbf16>
    %cst_19 = arith.constant dense<0.000000e+00> : vector<8x512xf32>
    %33 = tpu.matmul %31, %32, %cst_19 {dimension_numbers = #tpu.dot_dimension_numbers<[1], [0], [0], [1], [0, 0, 1, 1], [], []>} : vector<8x4xbf16>, vector<4x512xbf16>, vector<8x512xf32> -> vector<8x512xf32>
    %c0_20 = arith.constant 0 : index
    %c0_21 = arith.constant 0 : index
    %c0_22 = arith.constant 0 : index
    %34 = vector.load %arg4[%c0_20, %c0_21, %c0_22] : memref<5x8x1xf32, #tpu.memory_space<vmem>>, vector<1x8x1xf32>
    %35 = vector.shape_cast %34 : vector<1x8x1xf32> to vector<8x1xf32>
    %36 = vector.broadcast %35 : vector<8x1xf32> to vector<8x512xf32>
    %37 = arith.addf %33, %36 : vector<8x512xf32>
    %cst_23 = arith.constant 0.000000e+00 : f32
    %38 = vector.broadcast %cst_23 : f32 to vector<8x512xf32>
    %39 = arith.maximumf %37, %38 : vector<8x512xf32>
    %40 = vector.extract_strided_slice %39 {offsets = [0, 0], sizes = [8, 256], strides = [1, 1]} : vector<8x512xf32> to vector<8x256xf32>
    %c0_24 = arith.constant 0 : index
    %c256 = arith.constant 256 : index
    %41 = vector.load %arg9[%c0_24, %c256] : memref<8x1536xf32, #tpu.memory_space<vmem>>, vector<8x256xf32>
    tpu.vector_store %arg9[%c0_24, %c256], %40 {strides = array<i32>} : memref<8x1536xf32, #tpu.memory_space<vmem>>, vector<8x256xf32>,
    %42 = vector.extract_strided_slice %39 {offsets = [0, 256], sizes = [8, 256], strides = [1, 1]} : vector<8x512xf32> to vector<8x256xf32>
    %c0_25 = arith.constant 0 : index
    %c1024 = arith.constant 1024 : index
    %43 = vector.load %arg9[%c0_25, %c1024] : memref<8x1536xf32, #tpu.memory_space<vmem>>, vector<8x256xf32>
    tpu.vector_store %arg9[%c0_25, %c1024], %42 {strides = array<i32>} : memref<8x1536xf32, #tpu.memory_space<vmem>>, vector<8x256xf32>,
    %c3_i32 = arith.constant 3 : i32
    %44 = vector.broadcast %c3_i32 : i32 to vector<1x512xi32>
    %45 = arith.addi %24, %44 : vector<1x512xi32>
    %c16_i32_26 = arith.constant 16 : i32
    %46 = vector.broadcast %c16_i32_26 : i32 to vector<1x512xi32>
    %47 = arith.cmpi slt, %45, %46 : vector<1x512xi32>
    %c3_i32_27 = arith.constant 3 : i32
    %48 = vector.broadcast %c3_i32_27 : i32 to vector<1x512xi32>
    %49 = arith.cmpi sge, %24, %48 : vector<1x512xi32>
    %c0_28 = arith.constant 0 : index
    %c205 = arith.constant 205 : index
    %50 = vector.load %arg9[%c0_28, %c205] : memref<8x1536xf32, #tpu.memory_space<vmem>>, vector<8x256xf32>
    %c0_29 = arith.constant 0 : index
    %c973 = arith.constant 973 : index
    %51 = vector.load %arg9[%c0_29, %c973] : memref<8x1536xf32, #tpu.memory_space<vmem>>, vector<8x256xf32>
    %52 = tpu.concatenate %50, %51 in 1 : vector<8x256xf32>, vector<8x256xf32> -> vector<8x512xf32>
    %cst_30 = arith.constant 0.000000e+00 : f32
    %53 = vector.shape_cast %49 : vector<1x512xi1> to vector<1x512xi1>
    %54 = vector.broadcast %53 : vector<1x512xi1> to vector<8x512xi1>
    %55 = vector.broadcast %cst_30 : f32 to vector<8x512xf32>
    %56 = arith.select %54, %52, %55 : vector<8x512xi1>, vector<8x512xf32>
    %c0_31 = arith.constant 0 : index
    %c208 = arith.constant 208 : index
    %57 = vector.load %arg9[%c0_31, %c208] : memref<8x1536xf32, #tpu.memory_space<vmem>>, vector<8x256xf32>
    %c0_32 = arith.constant 0 : index
    %c976 = arith.constant 976 : index
    %58 = vector.load %arg9[%c0_32, %c976] : memref<8x1536xf32, #tpu.memory_space<vmem>>, vector<8x256xf32>
    %59 = tpu.concatenate %57, %58 in 1 : vector<8x256xf32>, vector<8x256xf32> -> vector<8x512xf32>
    %c0_33 = arith.constant 0 : index
    %c211 = arith.constant 211 : index
    %60 = vector.load %arg9[%c0_33, %c211] : memref<8x1536xf32, #tpu.memory_space<vmem>>, vector<8x256xf32>
    %c0_34 = arith.constant 0 : index
    %c979 = arith.constant 979 : index
    %61 = vector.load %arg9[%c0_34, %c979] : memref<8x1536xf32, #tpu.memory_space<vmem>>, vector<8x256xf32>
    %62 = tpu.concatenate %60, %61 in 1 : vector<8x256xf32>, vector<8x256xf32> -> vector<8x512xf32>
    %cst_35 = arith.constant 0.000000e+00 : f32
    %63 = vector.shape_cast %47 : vector<1x512xi1> to vector<1x512xi1>
    %64 = vector.broadcast %63 : vector<1x512xi1> to vector<8x512xi1>
    %65 = vector.broadcast %cst_35 : f32 to vector<8x512xf32>
    %66 = arith.select %64, %62, %65 : vector<8x512xi1>, vector<8x512xf32>
    %c0_36 = arith.constant 0 : index
    %c253 = arith.constant 253 : index
    %67 = vector.load %arg9[%c0_36, %c253] : memref<8x1536xf32, #tpu.memory_space<vmem>>, vector<8x256xf32>
    %c0_37 = arith.constant 0 : index
    %c1021 = arith.constant 1021 : index
    %68 = vector.load %arg9[%c0_37, %c1021] : memref<8x1536xf32, #tpu.memory_space<vmem>>, vector<8x256xf32>
    %69 = tpu.concatenate %67, %68 in 1 : vector<8x256xf32>, vector<8x256xf32> -> vector<8x512xf32>
    %cst_38 = arith.constant 0.000000e+00 : f32
    %70 = vector.shape_cast %49 : vector<1x512xi1> to vector<1x512xi1>
    %71 = vector.broadcast %70 : vector<1x512xi1> to vector<8x512xi1>
    %72 = vector.broadcast %cst_38 : f32 to vector<8x512xf32>
    %73 = arith.select %71, %69, %72 : vector<8x512xi1>, vector<8x512xf32>
    %c0_39 = arith.constant 0 : index
    %c256_40 = arith.constant 256 : index
    %74 = vector.load %arg9[%c0_39, %c256_40] : memref<8x1536xf32, #tpu.memory_space<vmem>>, vector<8x256xf32>
    %c0_41 = arith.constant 0 : index
    %c1024_42 = arith.constant 1024 : index
    %75 = vector.load %arg9[%c0_41, %c1024_42] : memref<8x1536xf32, #tpu.memory_space<vmem>>, vector<8x256xf32>
    %76 = tpu.concatenate %74, %75 in 1 : vector<8x256xf32>, vector<8x256xf32> -> vector<8x512xf32>
    %c0_43 = arith.constant 0 : index
    %c259 = arith.constant 259 : index
    %77 = vector.load %arg9[%c0_43, %c259] : memref<8x1536xf32, #tpu.memory_space<vmem>>, vector<8x256xf32>
    %c0_44 = arith.constant 0 : index
    %c1027 = arith.constant 1027 : index
    %78 = vector.load %arg9[%c0_44, %c1027] : memref<8x1536xf32, #tpu.memory_space<vmem>>, vector<8x256xf32>
    %79 = tpu.concatenate %77, %78 in 1 : vector<8x256xf32>, vector<8x256xf32> -> vector<8x512xf32>
    %cst_45 = arith.constant 0.000000e+00 : f32
    %80 = vector.shape_cast %47 : vector<1x512xi1> to vector<1x512xi1>
    %81 = vector.broadcast %80 : vector<1x512xi1> to vector<8x512xi1>
    %82 = vector.broadcast %cst_45 : f32 to vector<8x512xf32>
    %83 = arith.select %81, %79, %82 : vector<8x512xi1>, vector<8x512xf32>
    %c0_46 = arith.constant 0 : index
    %c301 = arith.constant 301 : index
    %84 = vector.load %arg9[%c0_46, %c301] : memref<8x1536xf32, #tpu.memory_space<vmem>>, vector<8x256xf32>
    %c0_47 = arith.constant 0 : index
    %c1069 = arith.constant 1069 : index
    %85 = vector.load %arg9[%c0_47, %c1069] : memref<8x1536xf32, #tpu.memory_space<vmem>>, vector<8x256xf32>
    %86 = tpu.concatenate %84, %85 in 1 : vector<8x256xf32>, vector<8x256xf32> -> vector<8x512xf32>
    %cst_48 = arith.constant 0.000000e+00 : f32
    %87 = vector.shape_cast %49 : vector<1x512xi1> to vector<1x512xi1>
    %88 = vector.broadcast %87 : vector<1x512xi1> to vector<8x512xi1>
    %89 = vector.broadcast %cst_48 : f32 to vector<8x512xf32>
    %90 = arith.select %88, %86, %89 : vector<8x512xi1>, vector<8x512xf32>
    %c0_49 = arith.constant 0 : index
    %c304 = arith.constant 304 : index
    %91 = vector.load %arg9[%c0_49, %c304] : memref<8x1536xf32, #tpu.memory_space<vmem>>, vector<8x256xf32>
    %c0_50 = arith.constant 0 : index
    %c1072 = arith.constant 1072 : index
    %92 = vector.load %arg9[%c0_50, %c1072] : memref<8x1536xf32, #tpu.memory_space<vmem>>, vector<8x256xf32>
    %93 = tpu.concatenate %91, %92 in 1 : vector<8x256xf32>, vector<8x256xf32> -> vector<8x512xf32>
    %c0_51 = arith.constant 0 : index
    %c307 = arith.constant 307 : index
    %94 = vector.load %arg9[%c0_51, %c307] : memref<8x1536xf32, #tpu.memory_space<vmem>>, vector<8x256xf32>
    %c0_52 = arith.constant 0 : index
    %c1075 = arith.constant 1075 : index
    %95 = vector.load %arg9[%c0_52, %c1075] : memref<8x1536xf32, #tpu.memory_space<vmem>>, vector<8x256xf32>
    %96 = tpu.concatenate %94, %95 in 1 : vector<8x256xf32>, vector<8x256xf32> -> vector<8x512xf32>
    %cst_53 = arith.constant 0.000000e+00 : f32
    %97 = vector.shape_cast %47 : vector<1x512xi1> to vector<1x512xi1>
    %98 = vector.broadcast %97 : vector<1x512xi1> to vector<8x512xi1>
    %99 = vector.broadcast %cst_53 : f32 to vector<8x512xf32>
    %100 = arith.select %98, %96, %99 : vector<8x512xi1>, vector<8x512xf32>
    %101 = tpu.concatenate %56, %59, %66, %73, %76, %83, %90, %93, %100 in 0 : vector<8x512xf32>, vector<8x512xf32>, vector<8x512xf32>, vector<8x512xf32>, vector<8x512xf32>, vector<8x512xf32>, vector<8x512xf32>, vector<8x512xf32>, vector<8x512xf32> -> vector<72x512xf32>
    %102 = arith.truncf %101 : vector<72x512xf32> to vector<72x512xbf16>
    %c0_54 = arith.constant 0 : index
    %c0_55 = arith.constant 0 : index
    %c0_56 = arith.constant 0 : index
    %103 = vector.load %arg5[%c0_54, %c0_55, %c0_56] : memref<5x4x72xbf16, #tpu.memory_space<vmem>>, vector<1x4x72xbf16>
    %104 = vector.shape_cast %103 : vector<1x4x72xbf16> to vector<4x72xbf16>
    %cst_57 = arith.constant dense<0.000000e+00> : vector<4x512xf32>
    %105 = tpu.matmul %104, %102, %cst_57 {dimension_numbers = #tpu.dot_dimension_numbers<[1], [0], [0], [1], [0, 0, 1, 1], [], []>} : vector<4x72xbf16>, vector<72x512xbf16>, vector<4x512xf32> -> vector<4x512xf32>
    %c0_58 = arith.constant 0 : index
    %c0_59 = arith.constant 0 : index
    %c0_60 = arith.constant 0 : index
    %106 = vector.load %arg6[%c0_58, %c0_59, %c0_60] : memref<5x4x1xf32, #tpu.memory_space<vmem>>, vector<1x4x1xf32>
    %107 = vector.shape_cast %106 : vector<1x4x1xf32> to vector<4x1xf32>
    %108 = vector.broadcast %107 : vector<4x1xf32> to vector<4x512xf32>
    %109 = arith.addf %105, %108 : vector<4x512xf32>
    %c16 = arith.constant 16 : index
    %c0_61 = arith.constant 0 : index
    %110 = vector.load %arg8[%c16, %c0_61] : memref<24x512xf32, #tpu.memory_space<vmem>>, vector<4x512xf32>
    tpu.vector_store %arg8[%c16, %c0_61], %109 {strides = array<i32>} : memref<24x512xf32, #tpu.memory_space<vmem>>, vector<4x512xf32>,
    %c16_62 = arith.constant 16 : index
    %c0_63 = arith.constant 0 : index
    %111 = vector.load %arg8[%c16_62, %c0_63] : memref<24x512xf32, #tpu.memory_space<vmem>>, vector<8x512xf32>
    %c1 = arith.constant 1 : index
    %c0_64 = arith.constant 0 : index
    %c0_65 = arith.constant 0 : index
    %112 = vector.load %arg1[%c1, %c0_64, %c0_65] : memref<5x20x1xf32, #tpu.memory_space<vmem>>, vector<1x8x1xf32>
    %113 = vector.shape_cast %112 : vector<1x8x1xf32> to vector<8x1xf32>
    %114 = vector.broadcast %113 : vector<8x1xf32> to vector<8x512xf32>
    %115 = arith.mulf %111, %114 : vector<8x512xf32>
    %c1_66 = arith.constant 1 : index
    %c0_67 = arith.constant 0 : index
    %c0_68 = arith.constant 0 : index
    %116 = vector.load %arg2[%c1_66, %c0_67, %c0_68] : memref<5x20x1xf32, #tpu.memory_space<vmem>>, vector<1x8x1xf32>
    %117 = vector.shape_cast %116 : vector<1x8x1xf32> to vector<8x1xf32>
    %118 = vector.broadcast %117 : vector<8x1xf32> to vector<8x512xf32>
    %119 = arith.addf %115, %118 : vector<8x512xf32>
    %cst_69 = arith.constant 0.000000e+00 : f32
    %120 = vector.broadcast %cst_69 : f32 to vector<8x512xf32>
    %121 = arith.maximumf %119, %120 : vector<8x512xf32>
    %c1_70 = arith.constant 1 : index
    %c0_71 = arith.constant 0 : index
    %c0_72 = arith.constant 0 : index
    %122 = vector.load %arg3[%c1_70, %c0_71, %c0_72] : memref<5x8x20xbf16, #tpu.memory_space<vmem>>, vector<1x8x8xbf16>
    %123 = vector.shape_cast %122 : vector<1x8x8xbf16> to vector<8x8xbf16>
    %124 = arith.truncf %121 : vector<8x512xf32> to vector<8x512xbf16>
    %cst_73 = arith.constant dense<0.000000e+00> : vector<8x512xf32>
    %125 = tpu.matmul %123, %124, %cst_73 {dimension_numbers = #tpu.dot_dimension_numbers<[1], [0], [0], [1], [0, 0, 1, 1], [], []>} : vector<8x8xbf16>, vector<8x512xbf16>, vector<8x512xf32> -> vector<8x512xf32>
    %c1_74 = arith.constant 1 : index
    %c0_75 = arith.constant 0 : index
    %c0_76 = arith.constant 0 : index
    %126 = vector.load %arg4[%c1_74, %c0_75, %c0_76] : memref<5x8x1xf32, #tpu.memory_space<vmem>>, vector<1x8x1xf32>
    %127 = vector.shape_cast %126 : vector<1x8x1xf32> to vector<8x1xf32>
    %128 = vector.broadcast %127 : vector<8x1xf32> to vector<8x512xf32>
    %129 = arith.addf %125, %128 : vector<8x512xf32>
    %cst_77 = arith.constant 0.000000e+00 : f32
    %130 = vector.broadcast %cst_77 : f32 to vector<8x512xf32>
    %131 = arith.maximumf %129, %130 : vector<8x512xf32>
    %132 = vector.extract_strided_slice %131 {offsets = [0, 0], sizes = [8, 256], strides = [1, 1]} : vector<8x512xf32> to vector<8x256xf32>
    %c0_78 = arith.constant 0 : index
    %c256_79 = arith.constant 256 : index
    %133 = vector.load %arg9[%c0_78, %c256_79] : memref<8x1536xf32, #tpu.memory_space<vmem>>, vector<8x256xf32>
    tpu.vector_store %arg9[%c0_78, %c256_79], %132 {strides = array<i32>} : memref<8x1536xf32, #tpu.memory_space<vmem>>, vector<8x256xf32>,
    %134 = vector.extract_strided_slice %131 {offsets = [0, 256], sizes = [8, 256], strides = [1, 1]} : vector<8x512xf32> to vector<8x256xf32>
    %c0_80 = arith.constant 0 : index
    %c1024_81 = arith.constant 1024 : index
    %135 = vector.load %arg9[%c0_80, %c1024_81] : memref<8x1536xf32, #tpu.memory_space<vmem>>, vector<8x256xf32>
    tpu.vector_store %arg9[%c0_80, %c1024_81], %134 {strides = array<i32>} : memref<8x1536xf32, #tpu.memory_space<vmem>>, vector<8x256xf32>,
    %c6_i32 = arith.constant 6 : i32
    %136 = vector.broadcast %c6_i32 : i32 to vector<1x512xi32>
    %137 = arith.addi %24, %136 : vector<1x512xi32>
    %c16_i32_82 = arith.constant 16 : i32
    %138 = vector.broadcast %c16_i32_82 : i32 to vector<1x512xi32>
    %139 = arith.cmpi slt, %137, %138 : vector<1x512xi32>
    %c6_i32_83 = arith.constant 6 : i32
    %140 = vector.broadcast %c6_i32_83 : i32 to vector<1x512xi32>
    %141 = arith.cmpi sge, %24, %140 : vector<1x512xi32>
    %c0_84 = arith.constant 0 : index
    %c154 = arith.constant 154 : index
    %142 = vector.load %arg9[%c0_84, %c154] : memref<8x1536xf32, #tpu.memory_space<vmem>>, vector<8x256xf32>
    %c0_85 = arith.constant 0 : index
    %c922 = arith.constant 922 : index
    %143 = vector.load %arg9[%c0_85, %c922] : memref<8x1536xf32, #tpu.memory_space<vmem>>, vector<8x256xf32>
    %144 = tpu.concatenate %142, %143 in 1 : vector<8x256xf32>, vector<8x256xf32> -> vector<8x512xf32>
    %cst_86 = arith.constant 0.000000e+00 : f32
    %145 = vector.shape_cast %141 : vector<1x512xi1> to vector<1x512xi1>
    %146 = vector.broadcast %145 : vector<1x512xi1> to vector<8x512xi1>
    %147 = vector.broadcast %cst_86 : f32 to vector<8x512xf32>
    %148 = arith.select %146, %144, %147 : vector<8x512xi1>, vector<8x512xf32>
    %c0_87 = arith.constant 0 : index
    %c160 = arith.constant 160 : index
    %149 = vector.load %arg9[%c0_87, %c160] : memref<8x1536xf32, #tpu.memory_space<vmem>>, vector<8x256xf32>
    %c0_88 = arith.constant 0 : index
    %c928 = arith.constant 928 : index
    %150 = vector.load %arg9[%c0_88, %c928] : memref<8x1536xf32, #tpu.memory_space<vmem>>, vector<8x256xf32>
    %151 = tpu.concatenate %149, %150 in 1 : vector<8x256xf32>, vector<8x256xf32> -> vector<8x512xf32>
    %c0_89 = arith.constant 0 : index
    %c166 = arith.constant 166 : index
    %152 = vector.load %arg9[%c0_89, %c166] : memref<8x1536xf32, #tpu.memory_space<vmem>>, vector<8x256xf32>
    %c0_90 = arith.constant 0 : index
    %c934 = arith.constant 934 : index
    %153 = vector.load %arg9[%c0_90, %c934] : memref<8x1536xf32, #tpu.memory_space<vmem>>, vector<8x256xf32>
    %154 = tpu.concatenate %152, %153 in 1 : vector<8x256xf32>, vector<8x256xf32> -> vector<8x512xf32>
    %cst_91 = arith.constant 0.000000e+00 : f32
    %155 = vector.shape_cast %139 : vector<1x512xi1> to vector<1x512xi1>
    %156 = vector.broadcast %155 : vector<1x512xi1> to vector<8x512xi1>
    %157 = vector.broadcast %cst_91 : f32 to vector<8x512xf32>
    %158 = arith.select %156, %154, %157 : vector<8x512xi1>, vector<8x512xf32>
    %c0_92 = arith.constant 0 : index
    %c250 = arith.constant 250 : index
    %159 = vector.load %arg9[%c0_92, %c250] : memref<8x1536xf32, #tpu.memory_space<vmem>>, vector<8x256xf32>
    %c0_93 = arith.constant 0 : index
    %c1018 = arith.constant 1018 : index
    %160 = vector.load %arg9[%c0_93, %c1018] : memref<8x1536xf32, #tpu.memory_space<vmem>>, vector<8x256xf32>
    %161 = tpu.concatenate %159, %160 in 1 : vector<8x256xf32>, vector<8x256xf32> -> vector<8x512xf32>
    %cst_94 = arith.constant 0.000000e+00 : f32
    %162 = vector.shape_cast %141 : vector<1x512xi1> to vector<1x512xi1>
    %163 = vector.broadcast %162 : vector<1x512xi1> to vector<8x512xi1>
    %164 = vector.broadcast %cst_94 : f32 to vector<8x512xf32>
    %165 = arith.select %163, %161, %164 : vector<8x512xi1>, vector<8x512xf32>
    %c0_95 = arith.constant 0 : index
    %c256_96 = arith.constant 256 : index
    %166 = vector.load %arg9[%c0_95, %c256_96] : memref<8x1536xf32, #tpu.memory_space<vmem>>, vector<8x256xf32>
    %c0_97 = arith.constant 0 : index
    %c1024_98 = arith.constant 1024 : index
    %167 = vector.load %arg9[%c0_97, %c1024_98] : memref<8x1536xf32, #tpu.memory_space<vmem>>, vector<8x256xf32>
    %168 = tpu.concatenate %166, %167 in 1 : vector<8x256xf32>, vector<8x256xf32> -> vector<8x512xf32>
    %c0_99 = arith.constant 0 : index
    %c262 = arith.constant 262 : index
    %169 = vector.load %arg9[%c0_99, %c262] : memref<8x1536xf32, #tpu.memory_space<vmem>>, vector<8x256xf32>
    %c0_100 = arith.constant 0 : index
    %c1030 = arith.constant 1030 : index
    %170 = vector.load %arg9[%c0_100, %c1030] : memref<8x1536xf32, #tpu.memory_space<vmem>>, vector<8x256xf32>
    %171 = tpu.concatenate %169, %170 in 1 : vector<8x256xf32>, vector<8x256xf32> -> vector<8x512xf32>
    %cst_101 = arith.constant 0.000000e+00 : f32
    %172 = vector.shape_cast %139 : vector<1x512xi1> to vector<1x512xi1>
    %173 = vector.broadcast %172 : vector<1x512xi1> to vector<8x512xi1>
    %174 = vector.broadcast %cst_101 : f32 to vector<8x512xf32>
    %175 = arith.select %173, %171, %174 : vector<8x512xi1>, vector<8x512xf32>
    %c0_102 = arith.constant 0 : index
    %c346 = arith.constant 346 : index
    %176 = vector.load %arg9[%c0_102, %c346] : memref<8x1536xf32, #tpu.memory_space<vmem>>, vector<8x256xf32>
    %c0_103 = arith.constant 0 : index
    %c1114 = arith.constant 1114 : index
    %177 = vector.load %arg9[%c0_103, %c1114] : memref<8x1536xf32, #tpu.memory_space<vmem>>, vector<8x256xf32>
    %178 = tpu.concatenate %176, %177 in 1 : vector<8x256xf32>, vector<8x256xf32> -> vector<8x512xf32>
    %cst_104 = arith.constant 0.000000e+00 : f32
    %179 = vector.shape_cast %141 : vector<1x512xi1> to vector<1x512xi1>
    %180 = vector.broadcast %179 : vector<1x512xi1> to vector<8x512xi1>
    %181 = vector.broadcast %cst_104 : f32 to vector<8x512xf32>
    %182 = arith.select %180, %178, %181 : vector<8x512xi1>, vector<8x512xf32>
    %c0_105 = arith.constant 0 : index
    %c352 = arith.constant 352 : index
    %183 = vector.load %arg9[%c0_105, %c352] : memref<8x1536xf32, #tpu.memory_space<vmem>>, vector<8x256xf32>
    %c0_106 = arith.constant 0 : index
    %c1120 = arith.constant 1120 : index
    %184 = vector.load %arg9[%c0_106, %c1120] : memref<8x1536xf32, #tpu.memory_space<vmem>>, vector<8x256xf32>
    %185 = tpu.concatenate %183, %184 in 1 : vector<8x256xf32>, vector<8x256xf32> -> vector<8x512xf32>
    %c0_107 = arith.constant 0 : index
    %c358 = arith.constant 358 : index
    %186 = vector.load %arg9[%c0_107, %c358] : memref<8x1536xf32, #tpu.memory_space<vmem>>, vector<8x256xf32>
    %c0_108 = arith.constant 0 : index
    %c1126 = arith.constant 1126 : index
    %187 = vector.load %arg9[%c0_108, %c1126] : memref<8x1536xf32, #tpu.memory_space<vmem>>, vector<8x256xf32>
    %188 = tpu.concatenate %186, %187 in 1 : vector<8x256xf32>, vector<8x256xf32> -> vector<8x512xf32>
    %cst_109 = arith.constant 0.000000e+00 : f32
    %189 = vector.shape_cast %139 : vector<1x512xi1> to vector<1x512xi1>
    %190 = vector.broadcast %189 : vector<1x512xi1> to vector<8x512xi1>
    %191 = vector.broadcast %cst_109 : f32 to vector<8x512xf32>
    %192 = arith.select %190, %188, %191 : vector<8x512xi1>, vector<8x512xf32>
    %193 = tpu.concatenate %148, %151, %158, %165, %168, %175, %182, %185, %192 in 0 : vector<8x512xf32>, vector<8x512xf32>, vector<8x512xf32>, vector<8x512xf32>, vector<8x512xf32>, vector<8x512xf32>, vector<8x512xf32>, vector<8x512xf32>, vector<8x512xf32> -> vector<72x512xf32>
    %194 = arith.truncf %193 : vector<72x512xf32> to vector<72x512xbf16>
    %c1_110 = arith.constant 1 : index
    %c0_111 = arith.constant 0 : index
    %c0_112 = arith.constant 0 : index
    %195 = vector.load %arg5[%c1_110, %c0_111, %c0_112] : memref<5x4x72xbf16, #tpu.memory_space<vmem>>, vector<1x4x72xbf16>
    %196 = vector.shape_cast %195 : vector<1x4x72xbf16> to vector<4x72xbf16>
    %cst_113 = arith.constant dense<0.000000e+00> : vector<4x512xf32>
    %197 = tpu.matmul %196, %194, %cst_113 {dimension_numbers = #tpu.dot_dimension_numbers<[1], [0], [0], [1], [0, 0, 1, 1], [], []>} : vector<4x72xbf16>, vector<72x512xbf16>, vector<4x512xf32> -> vector<4x512xf32>
    %c1_114 = arith.constant 1 : index
    %c0_115 = arith.constant 0 : index
    %c0_116 = arith.constant 0 : index
    %198 = vector.load %arg6[%c1_114, %c0_115, %c0_116] : memref<5x4x1xf32, #tpu.memory_space<vmem>>, vector<1x4x1xf32>
    %199 = vector.shape_cast %198 : vector<1x4x1xf32> to vector<4x1xf32>
    %200 = vector.broadcast %199 : vector<4x1xf32> to vector<4x512xf32>
    %201 = arith.addf %197, %200 : vector<4x512xf32>
    %c12 = arith.constant 12 : index
    %c0_117 = arith.constant 0 : index
    %202 = vector.load %arg8[%c12, %c0_117] : memref<24x512xf32, #tpu.memory_space<vmem>>, vector<4x512xf32>
    tpu.vector_store %arg8[%c12, %c0_117], %201 {strides = array<i32>} : memref<24x512xf32, #tpu.memory_space<vmem>>, vector<4x512xf32>,
    %c12_118 = arith.constant 12 : index
    %c0_119 = arith.constant 0 : index
    %203 = vector.load %arg8[%c12_118, %c0_119] : memref<24x512xf32, #tpu.memory_space<vmem>>, vector<12x512xf32>
    %c2 = arith.constant 2 : index
    %c0_120 = arith.constant 0 : index
    %c0_121 = arith.constant 0 : index
    %204 = vector.load %arg1[%c2, %c0_120, %c0_121] : memref<5x20x1xf32, #tpu.memory_space<vmem>>, vector<1x12x1xf32>
    %205 = vector.shape_cast %204 : vector<1x12x1xf32> to vector<12x1xf32>
    %206 = vector.broadcast %205 : vector<12x1xf32> to vector<12x512xf32>
    %207 = arith.mulf %203, %206 : vector<12x512xf32>
    %c2_122 = arith.constant 2 : index
    %c0_123 = arith.constant 0 : index
    %c0_124 = arith.constant 0 : index
    %208 = vector.load %arg2[%c2_122, %c0_123, %c0_124] : memref<5x20x1xf32, #tpu.memory_space<vmem>>, vector<1x12x1xf32>
    %209 = vector.shape_cast %208 : vector<1x12x1xf32> to vector<12x1xf32>
    %210 = vector.broadcast %209 : vector<12x1xf32> to vector<12x512xf32>
    %211 = arith.addf %207, %210 : vector<12x512xf32>
    %cst_125 = arith.constant 0.000000e+00 : f32
    %212 = vector.broadcast %cst_125 : f32 to vector<12x512xf32>
    %213 = arith.maximumf %211, %212 : vector<12x512xf32>
    %c2_126 = arith.constant 2 : index
    %c0_127 = arith.constant 0 : index
    %c0_128 = arith.constant 0 : index
    %214 = vector.load %arg3[%c2_126, %c0_127, %c0_128] : memref<5x8x20xbf16, #tpu.memory_space<vmem>>, vector<1x8x12xbf16>
    %215 = vector.shape_cast %214 : vector<1x8x12xbf16> to vector<8x12xbf16>
    %216 = arith.truncf %213 : vector<12x512xf32> to vector<12x512xbf16>
    %cst_129 = arith.constant dense<0.000000e+00> : vector<8x512xf32>
    %217 = tpu.matmul %215, %216, %cst_129 {dimension_numbers = #tpu.dot_dimension_numbers<[1], [0], [0], [1], [0, 0, 1, 1], [], []>} : vector<8x12xbf16>, vector<12x512xbf16>, vector<8x512xf32> -> vector<8x512xf32>
    %c2_130 = arith.constant 2 : index
    %c0_131 = arith.constant 0 : index
    %c0_132 = arith.constant 0 : index
    %218 = vector.load %arg4[%c2_130, %c0_131, %c0_132] : memref<5x8x1xf32, #tpu.memory_space<vmem>>, vector<1x8x1xf32>
    %219 = vector.shape_cast %218 : vector<1x8x1xf32> to vector<8x1xf32>
    %220 = vector.broadcast %219 : vector<8x1xf32> to vector<8x512xf32>
    %221 = arith.addf %217, %220 : vector<8x512xf32>
    %cst_133 = arith.constant 0.000000e+00 : f32
    %222 = vector.broadcast %cst_133 : f32 to vector<8x512xf32>
    %223 = arith.maximumf %221, %222 : vector<8x512xf32>
    %224 = vector.extract_strided_slice %223 {offsets = [0, 0], sizes = [8, 256], strides = [1, 1]} : vector<8x512xf32> to vector<8x256xf32>
    %c0_134 = arith.constant 0 : index
    %c256_135 = arith.constant 256 : index
    %225 = vector.load %arg9[%c0_134, %c256_135] : memref<8x1536xf32, #tpu.memory_space<vmem>>, vector<8x256xf32>
    tpu.vector_store %arg9[%c0_134, %c256_135], %224 {strides = array<i32>} : memref<8x1536xf32, #tpu.memory_space<vmem>>, vector<8x256xf32>,
    %226 = vector.extract_strided_slice %223 {offsets = [0, 256], sizes = [8, 256], strides = [1, 1]} : vector<8x512xf32> to vector<8x256xf32>
    %c0_136 = arith.constant 0 : index
    %c1024_137 = arith.constant 1024 : index
    %227 = vector.load %arg9[%c0_136, %c1024_137] : memref<8x1536xf32, #tpu.memory_space<vmem>>, vector<8x256xf32>
    tpu.vector_store %arg9[%c0_136, %c1024_137], %226 {strides = array<i32>} : memref<8x1536xf32, #tpu.memory_space<vmem>>, vector<8x256xf32>,
    %c12_i32 = arith.constant 12 : i32
    %228 = vector.broadcast %c12_i32 : i32 to vector<1x512xi32>
    %229 = arith.addi %24, %228 : vector<1x512xi32>
    %c16_i32_138 = arith.constant 16 : i32
    %230 = vector.broadcast %c16_i32_138 : i32 to vector<1x512xi32>
    %231 = arith.cmpi slt, %229, %230 : vector<1x512xi32>
    %c12_i32_139 = arith.constant 12 : i32
    %232 = vector.broadcast %c12_i32_139 : i32 to vector<1x512xi32>
    %233 = arith.cmpi sge, %24, %232 : vector<1x512xi32>
    %c0_140 = arith.constant 0 : index
    %c52 = arith.constant 52 : index
    %234 = vector.load %arg9[%c0_140, %c52] : memref<8x1536xf32, #tpu.memory_space<vmem>>, vector<8x256xf32>
    %c0_141 = arith.constant 0 : index
    %c820 = arith.constant 820 : index
    %235 = vector.load %arg9[%c0_141, %c820] : memref<8x1536xf32, #tpu.memory_space<vmem>>, vector<8x256xf32>
    %236 = tpu.concatenate %234, %235 in 1 : vector<8x256xf32>, vector<8x256xf32> -> vector<8x512xf32>
    %cst_142 = arith.constant 0.000000e+00 : f32
    %237 = vector.shape_cast %233 : vector<1x512xi1> to vector<1x512xi1>
    %238 = vector.broadcast %237 : vector<1x512xi1> to vector<8x512xi1>
    %239 = vector.broadcast %cst_142 : f32 to vector<8x512xf32>
    %240 = arith.select %238, %236, %239 : vector<8x512xi1>, vector<8x512xf32>
    %c0_143 = arith.constant 0 : index
    %c64 = arith.constant 64 : index
    %241 = vector.load %arg9[%c0_143, %c64] : memref<8x1536xf32, #tpu.memory_space<vmem>>, vector<8x256xf32>
    %c0_144 = arith.constant 0 : index
    %c832 = arith.constant 832 : index
    %242 = vector.load %arg9[%c0_144, %c832] : memref<8x1536xf32, #tpu.memory_space<vmem>>, vector<8x256xf32>
    %243 = tpu.concatenate %241, %242 in 1 : vector<8x256xf32>, vector<8x256xf32> -> vector<8x512xf32>
    %c0_145 = arith.constant 0 : index
    %c76 = arith.constant 76 : index
    %244 = vector.load %arg9[%c0_145, %c76] : memref<8x1536xf32, #tpu.memory_space<vmem>>, vector<8x256xf32>
    %c0_146 = arith.constant 0 : index
    %c844 = arith.constant 844 : index
    %245 = vector.load %arg9[%c0_146, %c844] : memref<8x1536xf32, #tpu.memory_space<vmem>>, vector<8x256xf32>
    %246 = tpu.concatenate %244, %245 in 1 : vector<8x256xf32>, vector<8x256xf32> -> vector<8x512xf32>
    %cst_147 = arith.constant 0.000000e+00 : f32
    %247 = vector.shape_cast %231 : vector<1x512xi1> to vector<1x512xi1>
    %248 = vector.broadcast %247 : vector<1x512xi1> to vector<8x512xi1>
    %249 = vector.broadcast %cst_147 : f32 to vector<8x512xf32>
    %250 = arith.select %248, %246, %249 : vector<8x512xi1>, vector<8x512xf32>
    %c0_148 = arith.constant 0 : index
    %c244 = arith.constant 244 : index
    %251 = vector.load %arg9[%c0_148, %c244] : memref<8x1536xf32, #tpu.memory_space<vmem>>, vector<8x256xf32>
    %c0_149 = arith.constant 0 : index
    %c1012 = arith.constant 1012 : index
    %252 = vector.load %arg9[%c0_149, %c1012] : memref<8x1536xf32, #tpu.memory_space<vmem>>, vector<8x256xf32>
    %253 = tpu.concatenate %251, %252 in 1 : vector<8x256xf32>, vector<8x256xf32> -> vector<8x512xf32>
    %cst_150 = arith.constant 0.000000e+00 : f32
    %254 = vector.shape_cast %233 : vector<1x512xi1> to vector<1x512xi1>
    %255 = vector.broadcast %254 : vector<1x512xi1> to vector<8x512xi1>
    %256 = vector.broadcast %cst_150 : f32 to vector<8x512xf32>
    %257 = arith.select %255, %253, %256 : vector<8x512xi1>, vector<8x512xf32>
    %c0_151 = arith.constant 0 : index
    %c256_152 = arith.constant 256 : index
    %258 = vector.load %arg9[%c0_151, %c256_152] : memref<8x1536xf32, #tpu.memory_space<vmem>>, vector<8x256xf32>
    %c0_153 = arith.constant 0 : index
    %c1024_154 = arith.constant 1024 : index
    %259 = vector.load %arg9[%c0_153, %c1024_154] : memref<8x1536xf32, #tpu.memory_space<vmem>>, vector<8x256xf32>
    %260 = tpu.concatenate %258, %259 in 1 : vector<8x256xf32>, vector<8x256xf32> -> vector<8x512xf32>
    %c0_155 = arith.constant 0 : index
    %c268 = arith.constant 268 : index
    %261 = vector.load %arg9[%c0_155, %c268] : memref<8x1536xf32, #tpu.memory_space<vmem>>, vector<8x256xf32>
    %c0_156 = arith.constant 0 : index
    %c1036 = arith.constant 1036 : index
    %262 = vector.load %arg9[%c0_156, %c1036] : memref<8x1536xf32, #tpu.memory_space<vmem>>, vector<8x256xf32>
    %263 = tpu.concatenate %261, %262 in 1 : vector<8x256xf32>, vector<8x256xf32> -> vector<8x512xf32>
    %cst_157 = arith.constant 0.000000e+00 : f32
    %264 = vector.shape_cast %231 : vector<1x512xi1> to vector<1x512xi1>
    %265 = vector.broadcast %264 : vector<1x512xi1> to vector<8x512xi1>
    %266 = vector.broadcast %cst_157 : f32 to vector<8x512xf32>
    %267 = arith.select %265, %263, %266 : vector<8x512xi1>, vector<8x512xf32>
    %c0_158 = arith.constant 0 : index
    %c436 = arith.constant 436 : index
    %268 = vector.load %arg9[%c0_158, %c436] : memref<8x1536xf32, #tpu.memory_space<vmem>>, vector<8x256xf32>
    %c0_159 = arith.constant 0 : index
    %c1204 = arith.constant 1204 : index
    %269 = vector.load %arg9[%c0_159, %c1204] : memref<8x1536xf32, #tpu.memory_space<vmem>>, vector<8x256xf32>
    %270 = tpu.concatenate %268, %269 in 1 : vector<8x256xf32>, vector<8x256xf32> -> vector<8x512xf32>
    %cst_160 = arith.constant 0.000000e+00 : f32
    %271 = vector.shape_cast %233 : vector<1x512xi1> to vector<1x512xi1>
    %272 = vector.broadcast %271 : vector<1x512xi1> to vector<8x512xi1>
    %273 = vector.broadcast %cst_160 : f32 to vector<8x512xf32>
    %274 = arith.select %272, %270, %273 : vector<8x512xi1>, vector<8x512xf32>
    %c0_161 = arith.constant 0 : index
    %c448 = arith.constant 448 : index
    %275 = vector.load %arg9[%c0_161, %c448] : memref<8x1536xf32, #tpu.memory_space<vmem>>, vector<8x256xf32>
    %c0_162 = arith.constant 0 : index
    %c1216 = arith.constant 1216 : index
    %276 = vector.load %arg9[%c0_162, %c1216] : memref<8x1536xf32, #tpu.memory_space<vmem>>, vector<8x256xf32>
    %277 = tpu.concatenate %275, %276 in 1 : vector<8x256xf32>, vector<8x256xf32> -> vector<8x512xf32>
    %c0_163 = arith.constant 0 : index
    %c460 = arith.constant 460 : index
    %278 = vector.load %arg9[%c0_163, %c460] : memref<8x1536xf32, #tpu.memory_space<vmem>>, vector<8x256xf32>
    %c0_164 = arith.constant 0 : index
    %c1228 = arith.constant 1228 : index
    %279 = vector.load %arg9[%c0_164, %c1228] : memref<8x1536xf32, #tpu.memory_space<vmem>>, vector<8x256xf32>
    %280 = tpu.concatenate %278, %279 in 1 : vector<8x256xf32>, vector<8x256xf32> -> vector<8x512xf32>
    %cst_165 = arith.constant 0.000000e+00 : f32
    %281 = vector.shape_cast %231 : vector<1x512xi1> to vector<1x512xi1>
    %282 = vector.broadcast %281 : vector<1x512xi1> to vector<8x512xi1>
    %283 = vector.broadcast %cst_165 : f32 to vector<8x512xf32>
    %284 = arith.select %282, %280, %283 : vector<8x512xi1>, vector<8x512xf32>
    %285 = tpu.concatenate %240, %243, %250, %257, %260, %267, %274, %277, %284 in 0 : vector<8x512xf32>, vector<8x512xf32>, vector<8x512xf32>, vector<8x512xf32>, vector<8x512xf32>, vector<8x512xf32>, vector<8x512xf32>, vector<8x512xf32>, vector<8x512xf32> -> vector<72x512xf32>
    %286 = arith.truncf %285 : vector<72x512xf32> to vector<72x512xbf16>
    %c2_166 = arith.constant 2 : index
    %c0_167 = arith.constant 0 : index
    %c0_168 = arith.constant 0 : index
    %287 = vector.load %arg5[%c2_166, %c0_167, %c0_168] : memref<5x4x72xbf16, #tpu.memory_space<vmem>>, vector<1x4x72xbf16>
    %288 = vector.shape_cast %287 : vector<1x4x72xbf16> to vector<4x72xbf16>
    %cst_169 = arith.constant dense<0.000000e+00> : vector<4x512xf32>
    %289 = tpu.matmul %288, %286, %cst_169 {dimension_numbers = #tpu.dot_dimension_numbers<[1], [0], [0], [1], [0, 0, 1, 1], [], []>} : vector<4x72xbf16>, vector<72x512xbf16>, vector<4x512xf32> -> vector<4x512xf32>
    %c2_170 = arith.constant 2 : index
    %c0_171 = arith.constant 0 : index
    %c0_172 = arith.constant 0 : index
    %290 = vector.load %arg6[%c2_170, %c0_171, %c0_172] : memref<5x4x1xf32, #tpu.memory_space<vmem>>, vector<1x4x1xf32>
    %291 = vector.shape_cast %290 : vector<1x4x1xf32> to vector<4x1xf32>
    %292 = vector.broadcast %291 : vector<4x1xf32> to vector<4x512xf32>
    %293 = arith.addf %289, %292 : vector<4x512xf32>
    %c8 = arith.constant 8 : index
    %c0_173 = arith.constant 0 : index
    %294 = vector.load %arg8[%c8, %c0_173] : memref<24x512xf32, #tpu.memory_space<vmem>>, vector<4x512xf32>
    tpu.vector_store %arg8[%c8, %c0_173], %293 {strides = array<i32>} : memref<24x512xf32, #tpu.memory_space<vmem>>, vector<4x512xf32>,
    %c8_174 = arith.constant 8 : index
    %c0_175 = arith.constant 0 : index
    %295 = vector.load %arg8[%c8_174, %c0_175] : memref<24x512xf32, #tpu.memory_space<vmem>>, vector<16x512xf32>
    %c3 = arith.constant 3 : index
    %c0_176 = arith.constant 0 : index
    %c0_177 = arith.constant 0 : index
    %296 = vector.load %arg1[%c3, %c0_176, %c0_177] : memref<5x20x1xf32, #tpu.memory_space<vmem>>, vector<1x16x1xf32>
    %297 = vector.shape_cast %296 : vector<1x16x1xf32> to vector<16x1xf32>
    %298 = vector.broadcast %297 : vector<16x1xf32> to vector<16x512xf32>
    %299 = arith.mulf %295, %298 : vector<16x512xf32>
    %c3_178 = arith.constant 3 : index
    %c0_179 = arith.constant 0 : index
    %c0_180 = arith.constant 0 : index
    %300 = vector.load %arg2[%c3_178, %c0_179, %c0_180] : memref<5x20x1xf32, #tpu.memory_space<vmem>>, vector<1x16x1xf32>
    %301 = vector.shape_cast %300 : vector<1x16x1xf32> to vector<16x1xf32>
    %302 = vector.broadcast %301 : vector<16x1xf32> to vector<16x512xf32>
    %303 = arith.addf %299, %302 : vector<16x512xf32>
    %cst_181 = arith.constant 0.000000e+00 : f32
    %304 = vector.broadcast %cst_181 : f32 to vector<16x512xf32>
    %305 = arith.maximumf %303, %304 : vector<16x512xf32>
    %c3_182 = arith.constant 3 : index
    %c0_183 = arith.constant 0 : index
    %c0_184 = arith.constant 0 : index
    %306 = vector.load %arg3[%c3_182, %c0_183, %c0_184] : memref<5x8x20xbf16, #tpu.memory_space<vmem>>, vector<1x8x16xbf16>
    %307 = vector.shape_cast %306 : vector<1x8x16xbf16> to vector<8x16xbf16>
    %308 = arith.truncf %305 : vector<16x512xf32> to vector<16x512xbf16>
    %cst_185 = arith.constant dense<0.000000e+00> : vector<8x512xf32>
    %309 = tpu.matmul %307, %308, %cst_185 {dimension_numbers = #tpu.dot_dimension_numbers<[1], [0], [0], [1], [0, 0, 1, 1], [], []>} : vector<8x16xbf16>, vector<16x512xbf16>, vector<8x512xf32> -> vector<8x512xf32>
    %c3_186 = arith.constant 3 : index
    %c0_187 = arith.constant 0 : index
    %c0_188 = arith.constant 0 : index
    %310 = vector.load %arg4[%c3_186, %c0_187, %c0_188] : memref<5x8x1xf32, #tpu.memory_space<vmem>>, vector<1x8x1xf32>
    %311 = vector.shape_cast %310 : vector<1x8x1xf32> to vector<8x1xf32>
    %312 = vector.broadcast %311 : vector<8x1xf32> to vector<8x512xf32>
    %313 = arith.addf %309, %312 : vector<8x512xf32>
    %cst_189 = arith.constant 0.000000e+00 : f32
    %314 = vector.broadcast %cst_189 : f32 to vector<8x512xf32>
    %315 = arith.maximumf %313, %314 : vector<8x512xf32>
    %c3_190 = arith.constant 3 : index
    %c0_191 = arith.constant 0 : index
    %c32 = arith.constant 32 : index
    %316 = vector.load %arg5[%c3_190, %c0_191, %c32] : memref<5x4x72xbf16, #tpu.memory_space<vmem>>, vector<1x4x8xbf16>
    %317 = vector.shape_cast %316 : vector<1x4x8xbf16> to vector<4x8xbf16>
    %318 = arith.truncf %315 : vector<8x512xf32> to vector<8x512xbf16>
    %cst_192 = arith.constant dense<0.000000e+00> : vector<4x512xf32>
    %319 = tpu.matmul %317, %318, %cst_192 {dimension_numbers = #tpu.dot_dimension_numbers<[1], [0], [0], [1], [0, 0, 1, 1], [], []>} : vector<4x8xbf16>, vector<8x512xbf16>, vector<4x512xf32> -> vector<4x512xf32>
    %c3_193 = arith.constant 3 : index
    %c0_194 = arith.constant 0 : index
    %c0_195 = arith.constant 0 : index
    %320 = vector.load %arg6[%c3_193, %c0_194, %c0_195] : memref<5x4x1xf32, #tpu.memory_space<vmem>>, vector<1x4x1xf32>
    %321 = vector.shape_cast %320 : vector<1x4x1xf32> to vector<4x1xf32>
    %322 = vector.broadcast %321 : vector<4x1xf32> to vector<4x512xf32>
    %323 = arith.addf %319, %322 : vector<4x512xf32>
    %c4 = arith.constant 4 : index
    %c0_196 = arith.constant 0 : index
    %324 = vector.load %arg8[%c4, %c0_196] : memref<24x512xf32, #tpu.memory_space<vmem>>, vector<4x512xf32>
    tpu.vector_store %arg8[%c4, %c0_196], %323 {strides = array<i32>} : memref<24x512xf32, #tpu.memory_space<vmem>>, vector<4x512xf32>,
    %c4_197 = arith.constant 4 : index
    %c0_198 = arith.constant 0 : index
    %325 = vector.load %arg8[%c4_197, %c0_198] : memref<24x512xf32, #tpu.memory_space<vmem>>, vector<20x512xf32>
    %c4_199 = arith.constant 4 : index
    %c0_200 = arith.constant 0 : index
    %c0_201 = arith.constant 0 : index
    %326 = vector.load %arg1[%c4_199, %c0_200, %c0_201] : memref<5x20x1xf32, #tpu.memory_space<vmem>>, vector<1x20x1xf32>
    %327 = vector.shape_cast %326 : vector<1x20x1xf32> to vector<20x1xf32>
    %328 = vector.broadcast %327 : vector<20x1xf32> to vector<20x512xf32>
    %329 = arith.mulf %325, %328 : vector<20x512xf32>
    %c4_202 = arith.constant 4 : index
    %c0_203 = arith.constant 0 : index
    %c0_204 = arith.constant 0 : index
    %330 = vector.load %arg2[%c4_202, %c0_203, %c0_204] : memref<5x20x1xf32, #tpu.memory_space<vmem>>, vector<1x20x1xf32>
    %331 = vector.shape_cast %330 : vector<1x20x1xf32> to vector<20x1xf32>
    %332 = vector.broadcast %331 : vector<20x1xf32> to vector<20x512xf32>
    %333 = arith.addf %329, %332 : vector<20x512xf32>
    %cst_205 = arith.constant 0.000000e+00 : f32
    %334 = vector.broadcast %cst_205 : f32 to vector<20x512xf32>
    %335 = arith.maximumf %333, %334 : vector<20x512xf32>
    %c4_206 = arith.constant 4 : index
    %c0_207 = arith.constant 0 : index
    %c0_208 = arith.constant 0 : index
    %336 = vector.load %arg3[%c4_206, %c0_207, %c0_208] : memref<5x8x20xbf16, #tpu.memory_space<vmem>>, vector<1x8x20xbf16>
    %337 = vector.shape_cast %336 : vector<1x8x20xbf16> to vector<8x20xbf16>
    %338 = arith.truncf %335 : vector<20x512xf32> to vector<20x512xbf16>
    %cst_209 = arith.constant dense<0.000000e+00> : vector<8x512xf32>
    %339 = tpu.matmul %337, %338, %cst_209 {dimension_numbers = #tpu.dot_dimension_numbers<[1], [0], [0], [1], [0, 0, 1, 1], [], []>} : vector<8x20xbf16>, vector<20x512xbf16>, vector<8x512xf32> -> vector<8x512xf32>
    %c4_210 = arith.constant 4 : index
    %c0_211 = arith.constant 0 : index
    %c0_212 = arith.constant 0 : index
    %340 = vector.load %arg4[%c4_210, %c0_211, %c0_212] : memref<5x8x1xf32, #tpu.memory_space<vmem>>, vector<1x8x1xf32>
    %341 = vector.shape_cast %340 : vector<1x8x1xf32> to vector<8x1xf32>
    %342 = vector.broadcast %341 : vector<8x1xf32> to vector<8x512xf32>
    %343 = arith.addf %339, %342 : vector<8x512xf32>
    %cst_213 = arith.constant 0.000000e+00 : f32
    %344 = vector.broadcast %cst_213 : f32 to vector<8x512xf32>
    %345 = arith.maximumf %343, %344 : vector<8x512xf32>
    %c4_214 = arith.constant 4 : index
    %c0_215 = arith.constant 0 : index
    %c32_216 = arith.constant 32 : index
    %346 = vector.load %arg5[%c4_214, %c0_215, %c32_216] : memref<5x4x72xbf16, #tpu.memory_space<vmem>>, vector<1x4x8xbf16>
    %347 = vector.shape_cast %346 : vector<1x4x8xbf16> to vector<4x8xbf16>
    %348 = arith.truncf %345 : vector<8x512xf32> to vector<8x512xbf16>
    %cst_217 = arith.constant dense<0.000000e+00> : vector<4x512xf32>
    %349 = tpu.matmul %347, %348, %cst_217 {dimension_numbers = #tpu.dot_dimension_numbers<[1], [0], [0], [1], [0, 0, 1, 1], [], []>} : vector<4x8xbf16>, vector<8x512xbf16>, vector<4x512xf32> -> vector<4x512xf32>
    %c4_218 = arith.constant 4 : index
    %c0_219 = arith.constant 0 : index
    %c0_220 = arith.constant 0 : index
    %350 = vector.load %arg6[%c4_218, %c0_219, %c0_220] : memref<5x4x1xf32, #tpu.memory_space<vmem>>, vector<1x4x1xf32>
    %351 = vector.shape_cast %350 : vector<1x4x1xf32> to vector<4x1xf32>
    %352 = vector.broadcast %351 : vector<4x1xf32> to vector<4x512xf32>
    %353 = arith.addf %349, %352 : vector<4x512xf32>
    %c0_221 = arith.constant 0 : index
    %c0_222 = arith.constant 0 : index
    %354 = vector.load %arg8[%c0_221, %c0_222] : memref<24x512xf32, #tpu.memory_space<vmem>>, vector<4x512xf32>
    tpu.vector_store %arg8[%c0_221, %c0_222], %353 {strides = array<i32>} : memref<24x512xf32, #tpu.memory_space<vmem>>, vector<4x512xf32>,
    return
  }
  func.func @transform_0(%arg0: i32) -> (i32, i32, i32) {
    %c0_i32 = arith.constant 0 : i32
    %c0_i32_0 = arith.constant 0 : i32
    %c0_i32_1 = arith.constant 0 : i32
    %c0_i32_2 = arith.constant 0 : i32
    return %c0_i32, %c0_i32_0, %c0_i32_1 : i32, i32, i32
  }
  func.func @transform_1(%arg0: i32) -> (i32, i32, i32) {
    %c0_i32 = arith.constant 0 : i32
    %c0_i32_0 = arith.constant 0 : i32
    %c0_i32_1 = arith.constant 0 : i32
    %c0_i32_2 = arith.constant 0 : i32
    return %c0_i32, %c0_i32_0, %c0_i32_1 : i32, i32, i32
  }
  func.func @transform_2(%arg0: i32) -> (i32, i32, i32) {
    %c0_i32 = arith.constant 0 : i32
    %c0_i32_0 = arith.constant 0 : i32
    %c0_i32_1 = arith.constant 0 : i32
    %c0_i32_2 = arith.constant 0 : i32
    return %c0_i32, %c0_i32_0, %c0_i32_1 : i32, i32, i32
  }
  func.func @transform_3(%arg0: i32) -> (i32, i32, i32) {
    %c0_i32 = arith.constant 0 : i32
    %c0_i32_0 = arith.constant 0 : i32
    %c0_i32_1 = arith.constant 0 : i32
    %c0_i32_2 = arith.constant 0 : i32
    return %c0_i32, %c0_i32_0, %c0_i32_1 : i32, i32, i32
  }
  func.func @transform_4(%arg0: i32) -> (i32, i32, i32) {
    %c0_i32 = arith.constant 0 : i32
    %c0_i32_0 = arith.constant 0 : i32
    %c0_i32_1 = arith.constant 0 : i32
    %c0_i32_2 = arith.constant 0 : i32
    return %c0_i32, %c0_i32_0, %c0_i32_1 : i32, i32, i32
  }
  func.func @transform_5(%arg0: i32) -> (i32, i32, i32) {
    %c0_i32 = arith.constant 0 : i32
    %c0_i32_0 = arith.constant 0 : i32
    %c0_i32_1 = arith.constant 0 : i32
    %c0_i32_2 = arith.constant 0 : i32
    return %c0_i32, %c0_i32_0, %c0_i32_1 : i32, i32, i32
  }
  func.func @transform_6(%arg0: i32) -> (i32, i32) {
    %c0_i32 = arith.constant 0 : i32
    %c0_i32_0 = arith.constant 0 : i32
    return %c0_i32, %arg0 : i32, i32
  }
  func.func @transform_7(%arg0: i32) -> (i32, i32) {
    %c0_i32 = arith.constant 0 : i32
    %c0_i32_0 = arith.constant 0 : i32
    return %c0_i32, %arg0 : i32, i32
  }
}

</mosaic_0001>

<bundles_post_ra>
// kernel: dense_aspp_block.1
= control target key start
LH: loop header
LB: loop body
LE: loop exit
PB: predicated region body
PF: predicated region fallthrough
CT: control target
= control target key end

     0   :  { %v2962_v2 = vmov 0   ;;  %v2963_v6 = vmov 0.0   ;;  %s2965_s15 = smov 48   ;;  %vm4087_vm0 = vcmask 1041408   ;;  %vm127_vm1 = vcmask 31744   ;;  %s2966_s26 = smov 45   ;;  %s4079_s6 = inlined_call_operand.vmem [shape: f32[4,512], index: 6, kind: input, shape index: {}]   ;;  %s4080_s7 = inlined_call_operand.vmem [shape: f32[24,512], index: 7, kind: output, shape index: {}]   ;;  %s4081_s3 = inlined_call_operand.vmem [shape: f32[5,8,1], index: 3, kind: input, shape index: {}]   ;;  %s4082_s2 = inlined_call_operand.vmem [shape: bf16[5,8,20], index: 2, kind: input, shape index: {}]   ;;  %s4083_s0 = inlined_call_operand.vmem [shape: f32[5,20,1], index: 0, kind: input, shape index: {}]   ;;  %s4084_s5 = inlined_call_operand.vmem [shape: f32[5,4,1], index: 5, kind: input, shape index: {}]   ;;  %s4085_s1 = inlined_call_operand.vmem [shape: f32[5,20,1], index: 1, kind: input, shape index: {}]   ;;  %s4086_s4 = inlined_call_operand.vmem [shape: bf16[5,4,72], index: 4, kind: input, shape index: {}]  }
   0x1   :  { %v88_v0 = vld [vmem:[%s4079_s6] sm:$0xff]  ;;  %v89_v1 = vld [vmem:[%s4079_s6 + $0x8] sm:$0xff]  ;;  %176 = vmatprep.mubr.bf16.mxu0 %v2962_v2  ;;  %217 = vmatprep.mubr.bf16.mxu1 %v2962_v2  ;;  %s2964_s6 = smov 51   ;;  %s2967_s27 = smov 3   ;;  %v2414_v49 = vld [vmem:[%s4083_s0 + $0x18] sm:$0xff]  ;;  %v35_v55 = vlaneseq  ;;  %vm297_vm2 = vcmask 392192  }
   0x2   :  { %v92_v3 = vcombine.low %v88_v0, %v88_v0  ;;  %97 = vst [vmem:[%s4080_s7 + $0x48] sm:$0xf0] %v88_v0  ;;  %v93_v4 = vcombine.low %v89_v1, %v89_v1  ;;  %99 = vst [vmem:[%s4080_s7 + $0x58] sm:$0xf0] %v89_v1  ;;  %2598 = vset.pattern.permute.xlu0 %v2962_v2  ;;  %v113_v5 = vld [vmem:[%s4081_s3] sm:$0xff]  ;;  %2719 = vset.pattern.permute.xlu1 %v2962_v2  ;;  %s2968_s28 = smov 83  }
   0x3   :  { %116 = vperm.xlu0 %2598, %v113_v5   ;;  %2600 = vrot.lane.b32.xlu1 %v2963_v6, %s2964_s6  ;;  %v108_v25 = vld [vmem:[%s4082_s2] sm:$0xf]  ;;  %s2969_s29 = smov 125   ;;  %s2970_s30 = smov 80   ;;  %v2417_v50 = vld [vmem:[%s4081_s3 + $0x8] sm:$0xff]  ;;  %v2415_v52 = vld [vmem:[%s4085_s1 + $0x18] sm:$0xff] }
   0x4   :  { %96 = vst [vmem:[%s4080_s7 + $0x40] sm:$0xf0] %v92_v3  ;;  %98 = vst [vmem:[%s4080_s7 + $0x50] sm:$0xf0] %v93_v4  ;;  %s2971_s8 = smov 77   ;;  %v36_v58 = vand.u32 127, %v35_v55 }
   0x5   :  { %v491_v51 = vld [vmem:[%s4084_s5] sm:$0xf]  ;;  %vm261_vm5 = vcmask 416768   ;;  %vm318_vm6 = vcmask 367616   ;;  %vm2972_vm7 = vmmov 1   ;;  %vm351_vm12 = vcmask 23552  }
   0x6   :  { %v39_v61 = vadd.s32 384, %v36_v58  ;;  %v38_v62 = vadd.s32 256, %v36_v58  ;;  %v37_v4 = vadd.s32 128, %v36_v58  ;;  %s2973_s18 = smov 102   ;;  %s2974_s19 = smov 96  }
   0x7   :  { %2605 = vrot.lane.b32.xlu0 %v2963_v6, %s2965_s15  ;;  %2610 = vrot.lane.b32.xlu1 %v2963_v6, %s2966_s26  ;;  %s2975_s14 = smov 90   ;;  %s2977_s16 = smov 38  }
   0x8   :  { %v3130_v1 = vand.u32 15, %v39_v61  ;;  %v3132_v3 = vand.u32 15, %v38_v62  ;;  %s2978_s17 = smov 122   ;;  %s2979_s20 = smov 32  }
   0x9   :  { %v101_v7 = vld [vmem:[%s4080_s7 + $0x48] sm:$0xf0]  ;;  %v103_v8 = vld [vmem:[%s4080_s7 + $0x58] sm:$0xf0]  ;;  %s2981_s11 = smov 64   ;;  %s2982_s12 = smov 76  }
   0xa   :  { %v105_v9 = vmax.f32 %v101_v7, 0.0  ;;  %v107_v10 = vmax.f32 %v103_v8, 0.0  ;;  %vm245_vm3 = vcmp.ge.s32.totalorder %v3130_v1, 3  ;;  %vm244_vm4 = vcmp.ge.s32.totalorder %v3132_v3, 3  ;;  %s2983_s13 = smov 12  }
   0xb   :  { %v100_v11 = vld [vmem:[%s4080_s7 + $0x40] sm:$0xf0]  ;;  %v102_v12 = vld [vmem:[%s4080_s7 + $0x50] sm:$0xf0]  ;;  %2615 = vrot.lane.b32.xlu0 %v2963_v6, %s2967_s27  ;;  %vm3150_vm8 = vmpackc.low %vm2972_vm7, %vm245_vm3 }
   0xc   :  { %v110_v13 = vpack.c.bf16 %v105_v9, %v105_v9  ;;  %v112_v14 = vpack.c.bf16 %v107_v10, %v107_v10  ;;  %v104_v15 = vmax.f32 %v100_v11, 0.0  ;;  %v106_v16 = vmax.f32 %v102_v12, 0.0  ;;  %vm3157_vm9 = vmpackc.low %vm2972_vm7, %vm244_vm4 }
   0xe   :  { %v124_v17 = vrot.slane %v110_v13, 2  ;;  %v126_v18 = vrot.slane %v112_v14, 2  ;;  %v109_v19 = vpack.c.bf16 %v104_v15, %v104_v15  ;;  %v111_v20 = vpack.c.bf16 %v106_v16, %v106_v16 }
   0xf   :  { %v3139_v15 = vand.u32 15, %v37_v4  ;;  %v3141_v16 = vand.u32 15, %v36_v58 }
  0x10   :  { %2358 = vmatprep.subr.msk.bf16.mxu0 %vm4087_vm0, %v124_v17  ;;  %2360 = vmatprep.subr.msk.bf16.mxu1 %vm4087_vm0, %v126_v18  ;;  %v123_v21 = vrot.slane %v109_v19, 2  ;;  %v125_v22 = vrot.slane %v111_v20, 2 }
  0x11   :  { %vm4089_vm10 = vcmp.ge.s32.totalorder %v3139_v15, 3  ;;  %vm4088_vm11 = vcmp.ge.s32.totalorder %v3141_v16, 3 }
  0x12   :  { %v133_v23 = vsel %vm4087_vm0, %v123_v21, 0  ;;  %v139_v24 = vsel %vm4087_vm0, %v125_v22, 0  ;;  %vm3183_vm13 = vmpackc.low %vm2972_vm7, %vm4089_vm10 }
  0x13   :  { %145 = vmatpush1.bf16.msra.mxu0 %v133_v23  ;;  %186 = vmatpush1.bf16.msra.mxu1 %v139_v24  ;;  %vm3190_vm14 = vmpackc.low %vm2972_vm7, %vm4088_vm11 }
  0x16   :  { %2359 = vmatmul.mubr.msk.bf16.vlgmr.msra.gmra.mrb[0].mxu0 %vm127_vm1, %v108_v25  ;;  %2361 = vmatmul.mubr.msk.bf16.vlgmr.msra.gmra.mrb[0].mxu1 %vm127_vm1, %v108_v25 }
  0x17   :  { %546 = vmatprep.mubr.bf16.mxu0 %v2962_v2  ;;  %587 = vmatprep.mubr.bf16.mxu1 %v2962_v2 }
  0x75   :  { %v2601_v53 = vpop.permute.xlu1 %2600 }
  0x76   :  { %v2603_v5 = vunpack.i.h.bf16 %v2601_v53  ;;  %v2602_v7 = vunpack.i.l.bf16 %v2601_v53 }
  0x79   :  { %v3120_v56 = vpop.permute.xlu1 %2610 }
  0x7a   :  { %v2613_v10 = vunpack.i.h.bf16 %v3120_v56  ;;  %v2612_v11 = vunpack.i.l.bf16 %v3120_v56 }
  0x82   :  { %v117_v26 = vpop.permute.xlu0 %116 }
  0x86   :  { %v2606_v54 = vpop.permute.xlu0 %2605 }
  0x87   :  { %v2608_v8 = vunpack.i.h.bf16 %v2606_v54  ;;  %v2607_v9 = vunpack.i.l.bf16 %v2606_v54  ;;  %v3196_v54 = vadd.s32 3, %v3141_v16 }
  0x89   :  { %vm238_vm10 = vcmp.lt.s32.totalorder %v3196_v54, 16 }
  0x8a   :  { %v3122_v57 = vpop.permute.xlu0 %2615 }
  0x8b   :  { %v2618_v12 = vunpack.i.h.bf16 %v3122_v57  ;;  %v2617_v55 = vunpack.i.l.bf16 %v3122_v57 }
  0xe9   :  { %v178_v27 = vpop.f32.mrb[0].mxu0  ;;  %v219_v28 = vpop.f32.mrb[0].mxu1 }
  0xea   :  { %v179_v29 = vadd.f32 %v178_v27, %v117_v26  ;;  %v220_v30 = vadd.f32 %v219_v28, %v117_v26  ;;  %v180_v31 = vpop.f32.mrb[1].mxu0  ;;  %v221_v32 = vpop.f32.mrb[1].mxu1 }
  0xeb   :  { %v181_v33 = vadd.f32 %v180_v31, %v117_v26  ;;  %v182_v34 = vpop.f32.mrb[2].mxu0  ;;  %v223_v35 = vpop.f32.mrb[2].mxu1  ;;  %v222_v41 = vadd.f32 %v221_v32, %v117_v26 }
  0xec   :  { %v3080_v36 = vmax.f32 %v179_v29, 0.0  ;;  %v3082_v37 = vmax.f32 %v220_v30, 0.0  ;;  %v183_v38 = vpop.f32.mrb[3].mxu0  ;;  %v224_v39 = vpop.f32.mrb[3].mxu1 }
  0xed   :  { %v3084_v40 = vmax.f32 %v181_v33, 0.0  ;;  %v3088_v43 = vmax.f32 %v222_v41, 0.0  ;;  %v3163_v33 = vadd.s32 3, %v3130_v1  ;;  %v3167_v38 = vadd.s32 3, %v3132_v3 }
  0xee   :  { %v2624_v42 = vpack.i.bf16 %v3082_v37, %v3080_v36  ;;  %v2704_v48 = vpack.i.bf16 %v3082_v37, %v2963_v6 }
  0xef   :  { %v2634_v44 = vpack.i.bf16 %v3084_v40, %v3080_v36  ;;  %v2649_v45 = vpack.i.bf16 %v3088_v43, %v3082_v37  ;;  %v2679_v46 = vpack.i.bf16 %v2963_v6, %v3088_v43  ;;  %v2684_v47 = vpack.i.bf16 %v2963_v6, %v3084_v40 }
  0xf0   :  { %2625 = vrot.lane.b32.xlu0 %v2624_v42, %s2968_s28  ;;  %2620 = vrot.lane.b32.xlu1 %v2624_v42, %s2969_s29  ;;  %vm4090_vm15 = vcmp.lt.s32.totalorder %v3163_v33, 16  ;;  %vm240_vm1 = vcmp.lt.s32.totalorder %v3167_v38, 16 }
  0xf1   :  { %vm2394_vm0 = vmpackc.low %vm245_vm3, %vm4090_vm15 }
  0xf2   :  { %vm2397_vm11 = vmpackc.low %vm244_vm4, %vm240_vm1 }
  0xf3   :  { %vm3230_vm3 = vmpackc.low %vm4090_vm15, %vm2972_vm7 }
  0xf4   :  { %2635 = vrot.lane.b32.xlu0 %v2634_v44, %s2964_s6  ;;  %2630 = vrot.lane.b32.xlu1 %v2624_v42, %s2970_s30  ;;  %v3174_v42 = vadd.s32 3, %v3139_v15 }
  0xf8   :  { %2650 = vrot.lane.b32.xlu0 %v2649_v45, %s2965_s15  ;;  %2640 = vrot.lane.b32.xlu1 %v2649_v45, %s2964_s6  ;;  %s2985_s6 = smov 116  }
  0xfc   :  { %2660 = vrot.lane.b32.xlu0 %v2649_v45, %s2966_s26  ;;  %2645 = vrot.lane.b32.xlu1 %v2634_v44, %s2965_s15  ;;  %s2976_s15 = smov 6  }
 0x100   :  { %2670 = vrot.lane.b32.xlu0 %v2649_v45, %s2967_s27  ;;  %2655 = vrot.lane.b32.xlu1 %v2634_v44, %s2966_s26 }
 0x104   :  { %2680 = vrot.lane.b32.xlu0 %v2679_v46, %s2969_s29  ;;  %2665 = vrot.lane.b32.xlu1 %v2634_v44, %s2967_s27 }
 0x108   :  { %2685 = vrot.lane.b32.xlu0 %v2684_v47, %s2968_s28  ;;  %2675 = vrot.lane.b32.xlu1 %v2684_v47, %s2969_s29 }
 0x10c   :  { %2695 = vrot.lane.b32.xlu0 %v2684_v47, %s2970_s30  ;;  %2690 = vrot.lane.b32.xlu1 %v2679_v46, %s2968_s28 }
 0x110   :  { %2710 = vrot.lane.b32.xlu0 %v2634_v44, %s2971_s8  ;;  %2700 = vrot.lane.b32.xlu1 %v2679_v46, %s2970_s30 }
 0x114   :  { %2715 = vrot.lane.b32.xlu0 %v2679_v46, %s2971_s8  ;;  %2705 = vrot.lane.b32.xlu1 %v2704_v48, %s2971_s8 }
 0x118   :  { %608 = vperm.xlu0 %2598, %v2414_v49   ;;  %494 = vperm.xlu1 %2719, %v491_v51  }
 0x11c   :  { %640 = vperm.xlu0 %2598, %v2417_v50   ;;  %619 = vperm.xlu1 %2719, %v2415_v52  }
 0x120   :  { %2721 = vrot.lane.b32.xlu1 %v2963_v6, %s2973_s18  ;;  %2726 = vrot.lane.b32.xlu0 %v2963_v6, %s2974_s19 }
 0x124   :  { %2731 = vrot.lane.b32.xlu1 %v2963_v6, %s2975_s14  ;;  %2736 = vrot.lane.b32.xlu0 %v2963_v6, %s2976_s15 }
 0x162   :  { %v3124_v59 = vpop.permute.xlu0 %2625  ;;  %v3126_v60 = vpop.permute.xlu1 %2620 }
 0x166   :  { %v2636_v63 = vpop.permute.xlu0 %2635  ;;  %v3128_v0 = vpop.permute.xlu1 %2630 }
 0x167   :  { %v2638_v21 = vunpack.i.h.bf16 %v2636_v63  ;;  %v2637_v22 = vunpack.i.l.bf16 %v2636_v63 }
 0x169   :  { %v262_v39 = vsel %vm261_vm5, %v2602_v7, %v2637_v22  ;;  %v263_v41 = vsel %vm261_vm5, %v2637_v22, %v2638_v21 }
 0x16a   :  { %v2651_v13 = vpop.permute.xlu0 %2650  ;;  %v2641_v14 = vpop.permute.xlu1 %2640 }
 0x16b   :  { %v2653_v17 = vunpack.i.h.bf16 %v2651_v13  ;;  %v2652_v18 = vunpack.i.l.bf16 %v2651_v13  ;;  %v2643_v19 = vunpack.i.h.bf16 %v2641_v14  ;;  %v2642_v20 = vunpack.i.l.bf16 %v2641_v14 }
 0x16d   :  { %v308_v23 = vsel %vm297_vm2, %v2608_v8, %v2652_v18  ;;  %v309_v24 = vsel %vm297_vm2, %v2652_v18, %v2653_v17  ;;  %v275_v25 = vsel %vm261_vm5, %v2603_v5, %v2642_v20  ;;  %v276_v26 = vsel %vm261_vm5, %v2642_v20, %v2643_v19 }
 0x16e   :  { %v2389_v28 = vpack.c.bf16 %v309_v24, %v276_v26  ;;  %v2392_v29 = vpack.c.bf16 %v308_v23, %v275_v25  ;;  %v2661_v30 = vpop.permute.xlu0 %2660  ;;  %v2646_v31 = vpop.permute.xlu1 %2645  ;;  %vm239_vm5 = vcmp.lt.s32.totalorder %v3174_v42, 16 }
 0x16f   :  { %v2648_v34 = vunpack.i.h.bf16 %v2646_v31  ;;  %v2647_v35 = vunpack.i.l.bf16 %v2646_v31  ;;  %v2663_v44 = vunpack.i.h.bf16 %v2661_v30  ;;  %v2662_v45 = vunpack.i.l.bf16 %v2661_v30 }
 0x170   :  { %2390 = vmatprep.subr.msk.bf16.mxu1 %vm3150_vm8, %v2389_v28 }
 0x171   :  { %v298_v46 = vsel %vm297_vm2, %v2607_v9, %v2647_v35  ;;  %v299_v47 = vsel %vm297_vm2, %v2647_v35, %v2648_v34  ;;  %2393 = vmatpush1.bf16.msk.msra.mxu1 %vm3157_vm9, %v2392_v29  ;;  %vm379_vm2 = vcmask 1022976   ;;  %v329_v4 = vsel %vm318_vm6, %v2613_v10, %v2662_v45 }
 0x172   :  { %v2363_v49 = vpack.c.bf16 %v299_v47, %v263_v41  ;;  %v2366_v50 = vpack.c.bf16 %v298_v46, %v262_v39  ;;  %v2671_v51 = vpop.permute.xlu0 %2670  ;;  %v2656_v52 = vpop.permute.xlu1 %2655  ;;  %v330_v5 = vsel %vm318_vm6, %v2662_v45, %v2663_v44  ;;  %v2623_v9 = vunpack.i.h.bf16 %v3126_v60 }
 0x173   :  { %v2673_v58 = vunpack.i.h.bf16 %v2671_v51  ;;  %v2672_v61 = vunpack.i.l.bf16 %v2671_v51  ;;  %v2658_v62 = vunpack.i.h.bf16 %v2656_v52  ;;  %v2657_v63 = vunpack.i.l.bf16 %v2656_v52 }
 0x174   :  { %2364 = vmatprep.subr.msk.bf16.mxu0 %vm3183_vm13, %v2363_v49  ;;  %v2622_v34 = vunpack.i.l.bf16 %v3126_v60  ;;  %v2627_v60 = vunpack.i.l.bf16 %v3124_v59 }
 0x175   :  { %v362_v7 = vsel %vm351_vm12, %v2618_v12, %v2672_v61  ;;  %v363_v8 = vsel %vm351_vm12, %v2672_v61, %v2673_v58  ;;  %2367 = vmatpush1.bf16.msk.msra.mxu0 %vm3190_vm14, %v2366_v50  ;;  %v319_v20 = vsel %vm318_vm6, %v2612_v11, %v2657_v63  ;;  %v320_v21 = vsel %vm318_vm6, %v2657_v63, %v2658_v62 }
 0x176   :  { %v2395_v13 = vpack.c.bf16 %v363_v8, %v330_v5  ;;  %v2398_v10 = vpack.c.bf16 %v362_v7, %v329_v4  ;;  %v2681_v14 = vpop.permute.xlu0 %2680  ;;  %v2666_v17 = vpop.permute.xlu1 %2665  ;;  %vm4113_vm6 = vcmp.ge.s32.totalorder %v3141_v16, 3  ;;  %v2632_v50 = vunpack.i.l.bf16 %v3128_v0 }
 0x177   :  { %v2683_v57 = vunpack.i.h.bf16 %v2681_v14  ;;  %v2682_v12 = vunpack.i.l.bf16 %v2681_v14  ;;  %v2668_v18 = vunpack.i.h.bf16 %v2666_v17  ;;  %v2667_v19 = vunpack.i.l.bf16 %v2666_v17  ;;  %vm2371_vm15 = vmpackc.low %vm4113_vm6, %vm238_vm10 }
 0x178   :  { %2396 = vmatprep.subr.msk.bf16.mxu1 %vm2394_vm0, %v2395_v13  ;;  %vm4112_vm0 = vcmp.ge.s32.totalorder %v3139_v15, 3  ;;  %v2628_v63 = vunpack.i.h.bf16 %v3124_v59  ;;  %v2633_v4 = vunpack.i.h.bf16 %v3128_v0  ;;  %vm833_vm6 = vcmask 736256  }
 0x179   :  { %v391_v23 = vsel %vm379_vm2, %v2623_v9, %v2682_v12  ;;  %v392_v24 = vsel %vm379_vm2, %v2682_v12, %v2683_v57  ;;  %v352_v25 = vsel %vm351_vm12, %v2617_v55, %v2667_v19  ;;  %v353_v56 = vsel %vm351_vm12, %v2667_v19, %v2668_v18  ;;  %2399 = vmatpush1.bf16.msk.msra.mxu1 %vm2397_vm11, %v2398_v10  ;;  %vm2368_vm4 = vmpackc.low %vm4112_vm0, %vm239_vm5 }
 0x17a   :  { %v2401_v11 = vpack.c.bf16 %v392_v24, %v3088_v43  ;;  %v2404_v26 = vpack.c.bf16 %v391_v23, %v3082_v37  ;;  %v2369_v28 = vpack.c.bf16 %v353_v56, %v320_v21  ;;  %v2372_v29 = vpack.c.bf16 %v352_v25, %v319_v20  ;;  %v2686_v30 = vpop.permute.xlu0 %2685  ;;  %v2676_v31 = vpop.permute.xlu1 %2675  ;;  %vm2403_vm11 = vmpackc.low %vm240_vm1, %vm2972_vm7 }
 0x17b   :  { %v2678_v35 = vunpack.i.h.bf16 %v2676_v31  ;;  %v2677_v39 = vunpack.i.l.bf16 %v2676_v31  ;;  %v2687_v43 = vunpack.i.l.bf16 %v2686_v30  ;;  %vm405_vm12 = vcmask 678912   ;;  %vm2374_vm0 = vmpackc.low %vm239_vm5, %vm2972_vm7 }
 0x17c   :  { %2370 = vmatprep.subr.msk.bf16.mxu0 %vm2368_vm4, %v2369_v28  ;;  %2402 = vmatprep.subr.msk.bf16.mxu1 %vm3230_vm3, %v2401_v11  ;;  %v2688_v37 = vunpack.i.h.bf16 %v2686_v30  ;;  %vm430_vm4 = vcmask 654336   ;;  %vm2377_vm3 = vmpackc.low %vm238_vm10, %vm2972_vm7 }
 0x17d   :  { %v380_v41 = vsel %vm379_vm2, %v2622_v34, %v2677_v39  ;;  %v381_v44 = vsel %vm379_vm2, %v2677_v39, %v2678_v35  ;;  %2373 = vmatpush1.bf16.msk.msra.mxu0 %vm2371_vm15, %v2372_v29  ;;  %2405 = vmatpush1.bf16.msk.msra.mxu1 %vm2403_vm11, %v2404_v26  ;;  %v406_v55 = vsel %vm405_vm12, %v2627_v60, %v2687_v43  ;;  %vm451_vm15 = vcmask 629760  }
 0x17e   :  { %v2375_v45 = vpack.c.bf16 %v381_v44, %v3084_v40  ;;  %v2378_v46 = vpack.c.bf16 %v380_v41, %v3080_v36  ;;  %v2696_v47 = vpop.permute.xlu0 %2695  ;;  %v2691_v49 = vpop.permute.xlu1 %2690  ;;  %v407_v40 = vsel %vm405_vm12, %v2687_v43, %v2688_v37  ;;  %vm760_vm2 = vcmp.ge.s32.totalorder %v3130_v1, 6 }
 0x17f   :  { %v2698_v51 = vunpack.i.h.bf16 %v2696_v47  ;;  %v2697_v52 = vunpack.i.l.bf16 %v2696_v47  ;;  %v2692_v58 = vunpack.i.l.bf16 %v2691_v49  ;;  %v2693_v62 = vunpack.i.h.bf16 %v2691_v49  ;;  %vm3430_vm11 = vmpackc.low %vm2972_vm7, %vm760_vm2 }
 0x180   :  { %2376 = vmatprep.subr.msk.bf16.mxu0 %vm2374_vm0, %v2375_v45  ;;  %vm4095_vm0 = vcmp.ge.s32.totalorder %v3139_v15, 6 }
 0x181   :  { %v431_v36 = vsel %vm430_vm4, %v2632_v50, %v2697_v52  ;;  %v432_v61 = vsel %vm430_vm4, %v2697_v52, %v2698_v51  ;;  %2379 = vmatpush1.bf16.msk.msra.mxu0 %vm2377_vm3, %v2378_v46  ;;  %v416_v57 = vsel %vm405_vm12, %v2628_v63, %v2692_v58  ;;  %v417_v12 = vsel %vm405_vm12, %v2692_v58, %v2693_v62 }
 0x182   :  { %v2381_v5 = vpack.c.bf16 %v432_v61, %v407_v40  ;;  %v2384_v7 = vpack.c.bf16 %v431_v36, %v406_v55  ;;  %v2711_v8 = vpop.permute.xlu0 %2710  ;;  %v2701_v9 = vpop.permute.xlu1 %2700  ;;  %vm866_vm3 = vcmask 48128  }
 0x183   :  { %v2713_v13 = vunpack.i.h.bf16 %v2711_v8  ;;  %v2712_v10 = vunpack.i.l.bf16 %v2711_v8  ;;  %v2703_v14 = vunpack.i.h.bf16 %v2701_v9  ;;  %v2702_v17 = vunpack.i.l.bf16 %v2701_v9 }
 0x184   :  { %2382 = vmatprep.subr.msk.bf16.mxu0 %vm3183_vm13, %v2381_v5  ;;  %vm4114_vm13 = vcmp.lt.s32.totalorder %v3163_v33, 16  ;;  %v490_v33 = vld [vmem:[%s4086_s4] sm:$0x3] }
 0x185   :  { %v452_v18 = vsel %vm451_vm15, %v2712_v10, %v2713_v13  ;;  %v441_v59 = vsel %vm430_vm4, %v2633_v4, %v2702_v17  ;;  %v442_v0 = vsel %vm430_vm4, %v2702_v17, %v2703_v14  ;;  %2385 = vmatpush1.bf16.msk.msra.mxu0 %vm3190_vm14, %v2384_v7  ;;  %vm776_vm14 = vcmask 834560  }
 0x186   :  { %v2407_v19 = vpack.c.bf16 %v442_v0, %v417_v12  ;;  %v2410_v20 = vpack.c.bf16 %v441_v59, %v416_v57  ;;  %v2716_v21 = vpop.permute.xlu0 %2715  ;;  %v2706_v22 = vpop.permute.xlu1 %2705  ;;  %v466_v23 = vsel %vm238_vm10, %v452_v18, 0.0  ;;  %vm4093_vm10 = vcmask 1043456  }
 0x187   :  { %v2718_v48 = vunpack.i.h.bf16 %v2716_v21  ;;  %v2717_v24 = vunpack.i.l.bf16 %v2716_v21  ;;  %v2708_v25 = vunpack.i.h.bf16 %v2706_v22  ;;  %v2707_v56 = vunpack.i.l.bf16 %v2706_v22 }
 0x188   :  { %2408 = vmatprep.subr.msk.bf16.mxu1 %vm3150_vm8, %v2407_v19  ;;  %v486_v28 = vpack.c.bf16 %v466_v23, %v466_v23  ;;  %vm4092_vm8 = vcmask 588800   ;;  %vm4094_vm4 = vcmp.ge.s32.totalorder %v3141_v16, 6 }
 0x189   :  { %v463_v11 = vsel %vm451_vm15, %v2717_v24, %v2718_v48  ;;  %v462_v26 = vsel %vm451_vm15, %v2708_v25, %v2717_v24  ;;  %v453_v53 = vsel %vm451_vm15, %v2713_v13, %v2707_v56  ;;  %2411 = vmatpush1.bf16.msk.msra.mxu1 %vm3157_vm9, %v2410_v20  ;;  %v2416_v20 = vld [vmem:[%s4082_s2 + $0x4] sm:$0xf]  ;;  %vm4091_vm9 = vcmask 64512   ;;  %vm3463_vm15 = vmpackc.low %vm2972_vm7, %vm4095_vm0 }
 0x18a   :  { %v469_v54 = vsel %vm4114_vm13, %v463_v11, 0.0  ;;  %v467_v29 = vsel %vm239_vm5, %v453_v53, 0.0  ;;  %v468_v27 = vsel %vm240_vm1, %v462_v26, 0.0  ;;  %v503_v32 = vsel %vm4093_vm10, %v486_v28, 0  ;;  %vm3470_vm13 = vmpackc.low %vm2972_vm7, %vm4094_vm4 }
 0x18b   :  { %v487_v30 = vpack.c.bf16 %v467_v29, %v467_v29  ;;  %v489_v31 = vpack.c.bf16 %v469_v54, %v469_v54  ;;  %v488_v34 = vpack.c.bf16 %v468_v27, %v468_v27  ;;  %vm812_vm1 = vcmask 785408  }
 0x18c   :  { %vm759_vm5 = vcmp.ge.s32.totalorder %v3132_v3, 6 }
 0x18d   :  { %2386 = vmatprep.subr.msk.bf16.mxu0 %vm4093_vm10, %v487_v30  ;;  %2412 = vmatprep.subr.msk.bf16.mxu1 %vm4093_vm10, %v489_v31  ;;  %v509_v35 = vsel %vm4093_vm10, %v488_v34, 0  ;;  %vm3437_vm12 = vmpackc.low %vm2972_vm7, %vm759_vm5 }
 0x18e   :  { %523 = vmatpush1.bf16.msra.mxu0 %v503_v32  ;;  %564 = vmatpush1.bf16.msra.mxu1 %v509_v35 }
 0x191   :  { %2387 = vmatmul.mubr.msk.bf16.vlgmr.msra.gmra.mrb[4].mxu0 %vm4092_vm8, %v490_v33  ;;  %2413 = vmatmul.mubr.msk.bf16.vlgmr.msra.gmra.mrb[4].mxu1 %vm4092_vm8, %v490_v33 }
 0x192   :  { %691 = vmatprep.mubr.bf16.mxu0 %v2962_v2  ;;  %732 = vmatprep.mubr.bf16.mxu1 %v2962_v2 }
 0x197   :  { %v495_v38 = vpop.permute.xlu1 %494  ;;  %v609_v51 = vpop.permute.xlu0 %608 }
 0x19b   :  { %v620_v62 = vpop.permute.xlu1 %619  ;;  %v641_v21 = vpop.permute.xlu0 %640 }
 0x264   :  { %v548_v42 = vpop.f32.mrb[4].mxu0  ;;  %v589_v39 = vpop.f32.mrb[4].mxu1 }
 0x265   :  { %v549_v43 = vadd.f32 %v548_v42, %v495_v38  ;;  %v590_v37 = vadd.f32 %v589_v39, %v495_v38  ;;  %v550_v41 = vpop.f32.mrb[5].mxu0  ;;  %v591_v44 = vpop.f32.mrb[5].mxu1 }
 0x266   :  { %v551_v60 = vadd.f32 %v550_v41, %v495_v38  ;;  %v592_v45 = vadd.f32 %v591_v44, %v495_v38  ;;  %v552_v46 = vpop.f32.mrb[6].mxu0  ;;  %v593_v47 = vpop.f32.mrb[6].mxu1  ;;  %v2478_v41 = vld [vmem:[%s4085_s1 + $0x30] sm:$0xff]  ;;  %v2477_v44 = vld [vmem:[%s4083_s0 + $0x38] sm:$0xf] }
 0x267   :  { %596 = vst [vmem:[%s4080_s7 + $0x40] sm:$0xf] %v549_v43  ;;  %598 = vst [vmem:[%s4080_s7 + $0x50] sm:$0xf] %v590_v37  ;;  %v553_v49 = vpop.f32.mrb[7].mxu0  ;;  %v594_v50 = vpop.f32.mrb[7].mxu1 }
 0x268   :  { %597 = vst [vmem:[%s4080_s7 + $0x48] sm:$0xf] %v551_v60  ;;  %599 = vst [vmem:[%s4080_s7 + $0x58] sm:$0xf] %v592_v45  ;;  %v2476_v43 = vld [vmem:[%s4083_s0 + $0x30] sm:$0xff]  ;;  %v2722_v46 = vpop.permute.xlu1 %2721  ;;  %v2727_v47 = vpop.permute.xlu0 %2726 }
 0x269   :  { %v2423_v37 = vld [vmem:[%s4084_s5 + $0x4] sm:$0xf]  ;;  %v2481_v60 = vld [vmem:[%s4081_s3 + $0x10] sm:$0xff]  ;;  %v2479_v45 = vld [vmem:[%s4085_s1 + $0x38] sm:$0xf] }
 0x26c   :  { %v3408_v49 = vpop.permute.xlu1 %2731  ;;  %v3410_v50 = vpop.permute.xlu0 %2736 }
 0x26e   :  { %v3326_v52 = vld [vmem:[%s4080_s7 + $0x40] sm:$0xff]  ;;  %v3331_v55 = vld [vmem:[%s4080_s7 + $0x50] sm:$0xff] }
 0x26f   :  { %v3336_v58 = vld [vmem:[%s4080_s7 + $0x48] sm:$0xff]  ;;  %v3341_v40 = vld [vmem:[%s4080_s7 + $0x58] sm:$0xff]  ;;  %v611_v36 = vmul.f32 %v609_v51, %v3326_v52  ;;  %v613_v61 = vmul.f32 %v609_v51, %v3331_v55 }
 0x270   :  { %v612_v63 = vmul.f32 %v609_v51, %v3336_v58  ;;  %v614_v4 = vmul.f32 %v609_v51, %v3341_v40 }
 0x271   :  { %v622_v5 = vadd.f32 %v620_v62, %v611_v36  ;;  %v624_v7 = vadd.f32 %v620_v62, %v613_v61 }
 0x272   :  { %v623_v8 = vadd.f32 %v620_v62, %v612_v63  ;;  %v625_v9 = vadd.f32 %v620_v62, %v614_v4  ;;  %v2724_v63 = vunpack.i.h.bf16 %v2722_v46  ;;  %v2723_v4 = vunpack.i.l.bf16 %v2722_v46 }
 0x273   :  { %v626_v13 = vmax.f32 %v622_v5, 0.0  ;;  %v628_v10 = vmax.f32 %v624_v7, 0.0  ;;  %v2729_v5 = vunpack.i.h.bf16 %v2727_v47  ;;  %v2728_v7 = vunpack.i.l.bf16 %v2727_v47 }
 0x274   :  { %v627_v14 = vmax.f32 %v623_v8, 0.0  ;;  %v629_v17 = vmax.f32 %v625_v9, 0.0  ;;  %v3476_v46 = vadd.s32 6, %v3141_v16  ;;  %v2738_v47 = vunpack.i.l.bf16 %v3410_v50 }
 0x275   :  { %v632_v57 = vpack.c.bf16 %v626_v13, %v626_v13  ;;  %v634_v12 = vpack.c.bf16 %v628_v10, %v628_v10  ;;  %v2734_v13 = vunpack.i.h.bf16 %v3408_v49 }
 0x276   :  { %v633_v18 = vpack.c.bf16 %v627_v14, %v627_v14  ;;  %v635_v59 = vpack.c.bf16 %v629_v17, %v629_v17  ;;  %v2733_v17 = vunpack.i.l.bf16 %v3408_v49  ;;  %vm753_vm0 = vcmp.lt.s32.totalorder %v3476_v46, 16 }
 0x277   :  { %v648_v0 = vsel %vm4093_vm10, %v632_v57, 0  ;;  %v654_v19 = vsel %vm4093_vm10, %v634_v12, 0 }
 0x278   :  { %2418 = vmatprep.subr.msk.bf16.mxu0 %vm4093_vm10, %v633_v18  ;;  %2420 = vmatprep.subr.msk.bf16.mxu1 %vm4093_vm10, %v635_v59  ;;  %v2739_v18 = vunpack.i.h.bf16 %v3410_v50 }
 0x279   :  { %660 = vmatpush1.bf16.msra.mxu0 %v648_v0  ;;  %701 = vmatpush1.bf16.msra.mxu1 %v654_v19 }
 0x27c   :  { %2419 = vmatmul.mubr.msk.bf16.vlgmr.msra.gmra.mrb[8].mxu0 %vm4091_vm9, %v2416_v20  ;;  %2421 = vmatmul.mubr.msk.bf16.vlgmr.msra.gmra.mrb[8].mxu1 %vm4091_vm9, %v2416_v20  ;;  %vm894_vm9 = vcmask 998400  }
 0x27d   :  { %1061 = vmatprep.mubr.bf16.mxu0 %v2962_v2  ;;  %1102 = vmatprep.mubr.bf16.mxu1 %v2962_v2 }
 0x34f   :  { %v693_v22 = vpop.f32.mrb[8].mxu0  ;;  %v734_v23 = vpop.f32.mrb[8].mxu1 }
 0x350   :  { %v694_v48 = vadd.f32 %v693_v22, %v641_v21  ;;  %v735_v24 = vadd.f32 %v734_v23, %v641_v21  ;;  %v695_v25 = vpop.f32.mrb[9].mxu0  ;;  %v736_v56 = vpop.f32.mrb[9].mxu1 }
 0x351   :  { %v737_v11 = vadd.f32 %v736_v56, %v641_v21  ;;  %v697_v26 = vpop.f32.mrb[10].mxu0  ;;  %v738_v53 = vpop.f32.mrb[10].mxu1  ;;  %v696_v30 = vadd.f32 %v695_v25, %v641_v21 }
 0x352   :  { %v3362_v28 = vmax.f32 %v694_v48, 0.0  ;;  %v3364_v54 = vmax.f32 %v735_v24, 0.0  ;;  %v698_v29 = vpop.f32.mrb[11].mxu0  ;;  %v739_v27 = vpop.f32.mrb[11].mxu1  ;;  %v3443_v26 = vadd.s32 6, %v3130_v1 }
 0x353   :  { %v3366_v31 = vmax.f32 %v737_v11, 0.0  ;;  %v3370_v32 = vmax.f32 %v696_v30, 0.0  ;;  %v3447_v27 = vadd.s32 6, %v3132_v3 }
 0x354   :  { %v2745_v34 = vpack.i.bf16 %v3364_v54, %v3362_v28  ;;  %v2825_v39 = vpack.i.bf16 %v3364_v54, %v2963_v6 }
 0x355   :  { %v2760_v35 = vpack.i.bf16 %v3366_v31, %v3364_v54  ;;  %v2755_v33 = vpack.i.bf16 %v3370_v32, %v3362_v28  ;;  %v2800_v38 = vpack.i.bf16 %v2963_v6, %v3366_v31  ;;  %v2805_v42 = vpack.i.bf16 %v2963_v6, %v3370_v32 }
 0x356   :  { %2746 = vrot.lane.b32.xlu0 %v2745_v34, %s2977_s16  ;;  %2741 = vrot.lane.b32.xlu1 %v2745_v34, %s2978_s17 }
 0x35a   :  { %2761 = vrot.lane.b32.xlu0 %v2760_v35, %s2973_s18  ;;  %2751 = vrot.lane.b32.xlu1 %v2745_v34, %s2979_s20 }
 0x35e   :  { %2771 = vrot.lane.b32.xlu0 %v2760_v35, %s2974_s19  ;;  %2756 = vrot.lane.b32.xlu1 %v2755_v33, %s2973_s18  ;;  %s2980_s18 = smov 26  }
 0x362   :  { %2781 = vrot.lane.b32.xlu0 %v2760_v35, %s2975_s14  ;;  %2766 = vrot.lane.b32.xlu1 %v2755_v33, %s2974_s19 }
 0x366   :  { %2791 = vrot.lane.b32.xlu0 %v2760_v35, %s2976_s15  ;;  %2776 = vrot.lane.b32.xlu1 %v2755_v33, %s2975_s14  ;;  %v3454_v35 = vadd.s32 6, %v3139_v15  ;;  %s2984_s14 = smov 52  }
 0x368   :  { %vm754_vm8 = vcmp.lt.s32.totalorder %v3454_v35, 16 }
 0x36a   :  { %2801 = vrot.lane.b32.xlu0 %v2800_v38, %s2978_s17  ;;  %2786 = vrot.lane.b32.xlu1 %v2755_v33, %s2976_s15 }
 0x36e   :  { %2806 = vrot.lane.b32.xlu0 %v2805_v42, %s2977_s16  ;;  %2796 = vrot.lane.b32.xlu1 %v2805_v42, %s2978_s17 }
 0x372   :  { %2816 = vrot.lane.b32.xlu0 %v2805_v42, %s2979_s20  ;;  %2811 = vrot.lane.b32.xlu1 %v2800_v38, %s2977_s16 }
 0x376   :  { %2831 = vrot.lane.b32.xlu0 %v2755_v33, %s2980_s18  ;;  %2821 = vrot.lane.b32.xlu1 %v2800_v38, %s2979_s20 }
 0x37a   :  { %2836 = vrot.lane.b32.xlu0 %v2800_v38, %s2980_s18  ;;  %2826 = vrot.lane.b32.xlu1 %v2825_v39, %s2980_s18 }
 0x37e   :  { %1140 = vperm.xlu0 %2598, %v2476_v43   ;;  %1011 = vperm.xlu1 %2719, %v2423_v37  }
 0x382   :  { %1164 = vperm.xlu0 %2598, %v2478_v41   ;;  %1144 = vperm.xlu1 %2719, %v2477_v44  }
 0x386   :  { %1201 = vperm.xlu0 %2598, %v2481_v60   ;;  %1168 = vperm.xlu1 %2719, %v2479_v45  }
 0x38a   :  { %2846 = vrot.lane.b32.xlu0 %v2963_v6, %s2981_s11  ;;  %2841 = vrot.lane.b32.xlu1 %v2963_v6, %s2982_s12 }
 0x38e   :  { %2856 = vrot.lane.b32.xlu0 %v2963_v6, %s2983_s13  ;;  %2851 = vrot.lane.b32.xlu1 %v2963_v6, %s2984_s14 }
 0x392   :  { %2861 = vrot.lane.b32.xlu0 %v2963_v6, %s2982_s12  ;;  %2866 = vrot.lane.b32.xlu1 %v2963_v6, %s2982_s12 }
 0x396   :  { %2871 = vrot.lane.b32.xlu0 %v2963_v6, %s2981_s11  ;;  %2876 = vrot.lane.b32.xlu1 %v2963_v6, %s2981_s11 }
 0x3c8   :  { %v3412_v51 = vpop.permute.xlu1 %2741  ;;  %v3414_v36 = vpop.permute.xlu0 %2746 }
 0x3cc   :  { %v3416_v61 = vpop.permute.xlu1 %2751  ;;  %v2762_v62 = vpop.permute.xlu0 %2761 }
 0x3cd   :  { %v2764_v8 = vunpack.i.h.bf16 %v2762_v62  ;;  %v2763_v9 = vunpack.i.l.bf16 %v2762_v62 }
 0x3cf   :  { %v790_v19 = vsel %vm776_vm14, %v2724_v63, %v2763_v9  ;;  %v791_v20 = vsel %vm776_vm14, %v2763_v9, %v2764_v8 }
 0x3d0   :  { %v2757_v10 = vpop.permute.xlu1 %2756  ;;  %v2772_v14 = vpop.permute.xlu0 %2771 }
 0x3d1   :  { %v2774_v57 = vunpack.i.h.bf16 %v2772_v14  ;;  %v2773_v12 = vunpack.i.l.bf16 %v2772_v14  ;;  %v2759_v59 = vunpack.i.h.bf16 %v2757_v10  ;;  %v2758_v0 = vunpack.i.l.bf16 %v2757_v10 }
 0x3d2   :  { %v2744_v10 = vunpack.i.h.bf16 %v3412_v51 }
 0x3d3   :  { %v823_v21 = vsel %vm812_vm1, %v2729_v5, %v2773_v12  ;;  %v824_v22 = vsel %vm812_vm1, %v2773_v12, %v2774_v57  ;;  %v777_v30 = vsel %vm776_vm14, %v2723_v4, %v2758_v0  ;;  %v778_v34 = vsel %vm776_vm14, %v2758_v0, %v2759_v59 }
 0x3d4   :  { %v2451_v48 = vpack.c.bf16 %v824_v22, %v791_v20  ;;  %v2454_v24 = vpack.c.bf16 %v823_v21, %v790_v19  ;;  %v2767_v25 = vpop.permute.xlu1 %2766  ;;  %v2782_v56 = vpop.permute.xlu0 %2781  ;;  %vm756_vm14 = vcmp.lt.s32.totalorder %v3443_v26, 16  ;;  %v2422_v26 = vld [vmem:[%s4086_s4 + $0x2] sm:$0x3] }
 0x3d5   :  { %v2769_v53 = vunpack.i.h.bf16 %v2767_v25  ;;  %v2768_v29 = vunpack.i.l.bf16 %v2767_v25  ;;  %v2784_v42 = vunpack.i.h.bf16 %v2782_v56  ;;  %v2783_v39 = vunpack.i.l.bf16 %v2782_v56  ;;  %vm2456_vm10 = vmpackc.low %vm760_vm2, %vm756_vm14 }
 0x3d6   :  { %2452 = vmatprep.subr.msk.bf16.mxu1 %vm3430_vm11, %v2451_v48  ;;  %vm3506_vm2 = vmpackc.low %vm756_vm14, %vm2972_vm7 }
 0x3d7   :  { %v813_v33 = vsel %vm812_vm1, %v2728_v7, %v2768_v29  ;;  %v814_v38 = vsel %vm812_vm1, %v2768_v29, %v2769_v53  ;;  %2455 = vmatpush1.bf16.msk.msra.mxu1 %vm3437_vm12, %v2454_v24  ;;  %vm755_vm1 = vcmp.lt.s32.totalorder %v3447_v27, 16  ;;  %v844_v7 = vsel %vm833_vm6, %v2734_v13, %v2783_v39 }
 0x3d8   :  { %v2425_v37 = vpack.c.bf16 %v814_v38, %v778_v34  ;;  %v2428_v41 = vpack.c.bf16 %v813_v33, %v777_v30  ;;  %v2777_v44 = vpop.permute.xlu1 %2776  ;;  %v2792_v60 = vpop.permute.xlu0 %2791  ;;  %v845_v8 = vsel %vm833_vm6, %v2783_v39, %v2784_v42  ;;  %vm2459_vm4 = vmpackc.low %vm759_vm5, %vm755_vm1  ;;  %v2743_v33 = vunpack.i.l.bf16 %v3412_v51 }
 0x3d9   :  { %v2794_v62 = vunpack.i.h.bf16 %v2792_v60  ;;  %v2793_v63 = vunpack.i.l.bf16 %v2792_v60  ;;  %v2779_v4 = vunpack.i.h.bf16 %v2777_v44  ;;  %v2778_v5 = vunpack.i.l.bf16 %v2777_v44 }
 0x3da   :  { %2426 = vmatprep.subr.msk.bf16.mxu0 %vm3463_vm15, %v2425_v37  ;;  %v2748_v51 = vunpack.i.l.bf16 %v3414_v36 }
 0x3db   :  { %v877_v9 = vsel %vm866_vm3, %v2739_v18, %v2793_v63  ;;  %v878_v50 = vsel %vm866_vm3, %v2793_v63, %v2794_v62  ;;  %2429 = vmatpush1.bf16.msk.msra.mxu0 %vm3470_vm13, %v2428_v41  ;;  %v834_v20 = vsel %vm833_vm6, %v2733_v17, %v2778_v5  ;;  %v835_v21 = vsel %vm833_vm6, %v2778_v5, %v2779_v4 }
 0x3dc   :  { %v2457_v14 = vpack.c.bf16 %v878_v50, %v845_v8  ;;  %v2460_v57 = vpack.c.bf16 %v877_v9, %v844_v7  ;;  %v2787_v12 = vpop.permute.xlu1 %2786  ;;  %v2802_v13 = vpop.permute.xlu0 %2801  ;;  %vm4126_vm6 = vcmp.ge.s32.totalorder %v3141_v16, 6  ;;  %v2753_v62 = vunpack.i.l.bf16 %v3416_v61 }
 0x3dd   :  { %v2789_v18 = vunpack.i.h.bf16 %v2787_v12  ;;  %v2788_v59 = vunpack.i.l.bf16 %v2787_v12  ;;  %v2804_v0 = vunpack.i.h.bf16 %v2802_v13  ;;  %v2803_v19 = vunpack.i.l.bf16 %v2802_v13 }
 0x3de   :  { %2458 = vmatprep.subr.msk.bf16.mxu1 %vm2456_vm10, %v2457_v14  ;;  %vm4125_vm10 = vcmp.ge.s32.totalorder %v3139_v15, 6  ;;  %v2749_v50 = vunpack.i.h.bf16 %v3414_v36 }
 0x3df   :  { %v867_v48 = vsel %vm866_vm3, %v2738_v47, %v2788_v59  ;;  %v868_v24 = vsel %vm866_vm3, %v2788_v59, %v2789_v18  ;;  %v906_v25 = vsel %vm894_vm9, %v2744_v10, %v2803_v19  ;;  %v907_v49 = vsel %vm894_vm9, %v2803_v19, %v2804_v0  ;;  %2461 = vmatpush1.bf16.msk.msra.mxu1 %vm2459_vm4, %v2460_v57  ;;  %vm2430_vm5 = vmpackc.low %vm4125_vm10, %vm754_vm8 }
 0x3e0   :  { %v2431_v17 = vpack.c.bf16 %v868_v24, %v835_v21  ;;  %v2434_v56 = vpack.c.bf16 %v867_v48, %v834_v20  ;;  %v2463_v53 = vpack.c.bf16 %v907_v49, %v3366_v31  ;;  %v2466_v29 = vpack.c.bf16 %v906_v25, %v3364_v54  ;;  %v2797_v30 = vpop.permute.xlu1 %2796  ;;  %v2807_v34 = vpop.permute.xlu0 %2806  ;;  %vm2433_vm3 = vmpackc.low %vm4126_vm6, %vm753_vm0 }
 0x3e1   :  { %v2799_v38 = vunpack.i.h.bf16 %v2797_v30  ;;  %v2798_v42 = vunpack.i.l.bf16 %v2797_v30  ;;  %vm2465_vm4 = vmpackc.low %vm755_vm1, %vm2972_vm7  ;;  %v2808_v39 = vunpack.i.l.bf16 %v2807_v34  ;;  %vm920_vm10 = vcmask 310272  }
 0x3e2   :  { %2432 = vmatprep.subr.msk.bf16.mxu0 %vm2430_vm5, %v2431_v17  ;;  %2464 = vmatprep.subr.msk.bf16.mxu1 %vm3506_vm2, %v2463_v53  ;;  %v2809_v37 = vunpack.i.h.bf16 %v2807_v34  ;;  %vm2436_vm6 = vmpackc.low %vm754_vm8, %vm2972_vm7  ;;  %vm945_vm2 = vcmask 261120   ;;  %vm966_vm5 = vcmask 211968   ;;  %v2754_v10 = vunpack.i.h.bf16 %v3416_v61 }
 0x3e3   :  { %v895_v54 = vsel %vm894_vm9, %v2743_v33, %v2798_v42  ;;  %v896_v31 = vsel %vm894_vm9, %v2798_v42, %v2799_v38  ;;  %2435 = vmatpush1.bf16.msk.msra.mxu0 %vm2433_vm3, %v2434_v56  ;;  %2467 = vmatpush1.bf16.msk.msra.mxu1 %vm2465_vm4, %v2466_v29  ;;  %vm2439_vm9 = vmpackc.low %vm753_vm0, %vm2972_vm7  ;;  %v921_v5 = vsel %vm920_vm10, %v2748_v51, %v2808_v39  ;;  %vm4096_vm3 = vcmask 1045504  }
 0x3e4   :  { %v2437_v41 = vpack.c.bf16 %v896_v31, %v3370_v32  ;;  %v2440_v44 = vpack.c.bf16 %v895_v54, %v3362_v28  ;;  %v2812_v60 = vpop.permute.xlu1 %2811  ;;  %v2817_v47 = vpop.permute.xlu0 %2816  ;;  %v922_v32 = vsel %vm920_vm10, %v2808_v39, %v2809_v37  ;;  %vm1212_vm4 = vcmask 97280  }
 0x3e5   :  { %v2819_v63 = vunpack.i.h.bf16 %v2817_v47  ;;  %v2818_v4 = vunpack.i.l.bf16 %v2817_v47  ;;  %v2813_v7 = vunpack.i.l.bf16 %v2812_v60  ;;  %v2814_v28 = vunpack.i.h.bf16 %v2812_v60 }
 0x3e6   :  { %2438 = vmatprep.subr.msk.bf16.mxu0 %vm2436_vm6, %v2437_v41  ;;  %vm1382_vm6 = vcmask 523264  }
 0x3e7   :  { %v946_v8 = vsel %vm945_vm2, %v2753_v62, %v2818_v4  ;;  %v947_v9 = vsel %vm945_vm2, %v2818_v4, %v2819_v63  ;;  %2441 = vmatpush1.bf16.msk.msra.mxu0 %vm2439_vm9, %v2440_v44  ;;  %v931_v20 = vsel %vm920_vm10, %v2749_v50, %v2813_v7  ;;  %v932_v21 = vsel %vm920_vm10, %v2813_v7, %v2814_v28 }
 0x3e8   :  { %v2443_v14 = vpack.c.bf16 %v947_v9, %v922_v32  ;;  %v2446_v57 = vpack.c.bf16 %v946_v8, %v921_v5  ;;  %v2822_v12 = vpop.permute.xlu1 %2821  ;;  %v2832_v13 = vpop.permute.xlu0 %2831  ;;  %vm4097_vm10 = vcmask 621568   ;;  %vm1330_vm9 = vcmp.ge.s32.totalorder %v3130_v1, 12 }
 0x3e9   :  { %v2824_v18 = vunpack.i.h.bf16 %v2822_v12  ;;  %v2823_v59 = vunpack.i.l.bf16 %v2822_v12  ;;  %v2834_v0 = vunpack.i.h.bf16 %v2832_v13  ;;  %v2833_v19 = vunpack.i.l.bf16 %v2832_v13 }
 0x3ea   :  { %2444 = vmatprep.subr.msk.bf16.mxu0 %vm3463_vm15, %v2443_v14 }
 0x3eb   :  { %v956_v22 = vsel %vm945_vm2, %v2754_v10, %v2823_v59  ;;  %v957_v36 = vsel %vm945_vm2, %v2823_v59, %v2824_v18  ;;  %v967_v61 = vsel %vm966_vm5, %v2833_v19, %v2834_v0  ;;  %2447 = vmatpush1.bf16.msk.msra.mxu0 %vm3470_vm13, %v2446_v57  ;;  %vm4099_vm2 = vcmp.ge.s32.totalorder %v3139_v15, 12 }
 0x3ec   :  { %v2469_v48 = vpack.c.bf16 %v957_v36, %v932_v21  ;;  %v2472_v24 = vpack.c.bf16 %v956_v22, %v931_v20  ;;  %v2827_v25 = vpop.permute.xlu1 %2826  ;;  %v2837_v49 = vpop.permute.xlu0 %2836  ;;  %v981_v17 = vsel %vm753_vm0, %v967_v61, 0.0 }
 0x3ed   :  { %v2829_v43 = vunpack.i.h.bf16 %v2827_v25  ;;  %v2828_v56 = vunpack.i.l.bf16 %v2827_v25  ;;  %v2839_v53 = vunpack.i.h.bf16 %v2837_v49  ;;  %v2838_v29 = vunpack.i.l.bf16 %v2837_v49 }
 0x3ee   :  { %2470 = vmatprep.subr.msk.bf16.mxu1 %vm3430_vm11, %v2469_v48  ;;  %v1001_v33 = vpack.c.bf16 %v981_v17, %v981_v17  ;;  %vm4127_vm11 = vcmask 1043456  }
 0x3ef   :  { %v968_v30 = vsel %vm966_vm5, %v2834_v0, %v2828_v56  ;;  %v977_v34 = vsel %vm966_vm5, %v2829_v43, %v2838_v29  ;;  %v978_v45 = vsel %vm966_vm5, %v2838_v29, %v2839_v53  ;;  %2473 = vmatpush1.bf16.msk.msra.mxu1 %vm3437_vm12, %v2472_v24  ;;  %vm4128_vm0 = vmmov %vm4127_vm11  ;;  %vm4098_vm5 = vcmp.ge.s32.totalorder %v3141_v16, 12 }
 0x3f0   :  { %v982_v46 = vsel %vm754_vm8, %v968_v30, 0.0  ;;  %v984_v38 = vsel %vm756_vm14, %v978_v45, 0.0  ;;  %v983_v23 = vsel %vm755_vm1, %v977_v34, 0.0  ;;  %vm4129_vm15 = vmmov %vm4128_vm0  ;;  %vm4131_vm8 = vcmask 588800  }
 0x3f1   :  { %v1002_v42 = vpack.c.bf16 %v982_v46, %v982_v46  ;;  %v1004_v39 = vpack.c.bf16 %v984_v38, %v984_v38  ;;  %v1003_v54 = vpack.c.bf16 %v983_v23, %v983_v23  ;;  %v1018_v11 = vsel %vm4129_vm15, %v1001_v33, 0  ;;  %vm4130_vm12 = vmmov %vm4128_vm0 }
 0x3f2   :  { %vm4132_vm13 = vmmov %vm4131_vm8 }
 0x3f3   :  { %2448 = vmatprep.subr.msk.bf16.mxu0 %vm4127_vm11, %v1002_v42  ;;  %2474 = vmatprep.subr.msk.bf16.mxu1 %vm4128_vm0, %v1004_v39  ;;  %v1024_v31 = vsel %vm4130_vm12, %v1003_v54, 0  ;;  %vm4133_vm14 = vmmov %vm4128_vm0  ;;  %vm1329_vm11 = vcmp.ge.s32.totalorder %v3132_v3, 12 }
 0x3f4   :  { %1038 = vmatpush1.bf16.msra.mxu0 %v1018_v11  ;;  %1079 = vmatpush1.bf16.msra.mxu1 %v1024_v31  ;;  %vm4134_vm1 = vmmov %vm4128_vm0 }
 0x3f5   :  { %vm3757_vm0 = vmpackc.low %vm2972_vm7, %vm4099_vm2 }
 0x3f6   :  { %vm3768_vm15 = vmpackc.low %vm2972_vm7, %vm1330_vm9 }
 0x3f7   :  { %2449 = vmatmul.mubr.msk.bf16.vlgmr.msra.gmra.mrb[12].mxu0 %vm4131_vm8, %v2422_v26  ;;  %2475 = vmatmul.mubr.msk.bf16.vlgmr.msra.gmra.mrb[12].mxu1 %vm4132_vm13, %v2422_v26  ;;  %vm3775_vm12 = vmpackc.low %vm2972_vm7, %vm4098_vm5  ;;  %vm4100_vm13 = vcmask 424960  }
 0x3f8   :  { %1261 = vmatprep.mubr.bf16.mxu0 %v2962_v2  ;;  %1302 = vmatprep.mubr.bf16.mxu1 %v2962_v2  ;;  %vm3785_vm8 = vmpackc.low %vm2972_vm7, %vm1329_vm11 }
 0x3fd   :  { %v1012_v27 = vpop.permute.xlu1 %1011  ;;  %v1141_v37 = vpop.permute.xlu0 %1140 }
 0x3fe   :  { %v1146_v13 = vrot.slane %v1141_v37, 4 }
 0x401   :  { %v1145_v35 = vpop.permute.xlu1 %1144  ;;  %v1165_v12 = vpop.permute.xlu0 %1164 }
 0x402   :  { %v1147_v10 = vrot.slane %v1145_v35, 4  ;;  %v1170_v0 = vrot.slane %v1165_v12, 4 }
 0x404   :  { %v1148_v59 = vsel %vm4133_vm14, %v1146_v13, %v1147_v10 }
 0x405   :  { %v1169_v51 = vpop.permute.xlu1 %1168  ;;  %v1155_v20 = vmul.f32 %v1148_v59, %v3326_v52  ;;  %v1157_v21 = vmul.f32 %v1148_v59, %v3331_v55  ;;  %v1156_v22 = vmul.f32 %v1148_v59, %v3336_v58  ;;  %v1158_v36 = vmul.f32 %v1148_v59, %v3341_v40 }
 0x406   :  { %v1171_v18 = vrot.slane %v1169_v51, 4 }
 0x408   :  { %v1172_v19 = vsel %vm4134_vm1, %v1170_v0, %v1171_v18 }
 0x409   :  { %v1179_v58 = vadd.f32 %v1172_v19, %v1155_v20  ;;  %v1181_v40 = vadd.f32 %v1172_v19, %v1157_v21  ;;  %v1180_v49 = vadd.f32 %v1172_v19, %v1156_v22  ;;  %v1182_v17 = vadd.f32 %v1172_v19, %v1158_v36 }
 0x40b   :  { %v1187_v33 = vmax.f32 %v1179_v58, 0.0  ;;  %v1189_v38 = vmax.f32 %v1181_v40, 0.0  ;;  %v1188_v23 = vmax.f32 %v1180_v49, 0.0  ;;  %v1190_v42 = vmax.f32 %v1182_v17, 0.0  ;;  %v2542_v58 = vld [vmem:[%s4085_s1 + $0x48] sm:$0xff]  ;;  %v2543_v40 = vld [vmem:[%s4085_s1 + $0x50] sm:$0xff] }
 0x40c   :  { %v2549_v49 = vld [vmem:[%s4084_s5 + $0xc] sm:$0xf]  ;;  %v2550_v17 = vld.sshfl [vmem:[%s4086_s4 + $0x6] sm:$0x3 pattern:$0x76325410] }
 0x4ca   :  { %v1063_v41 = vpop.f32.mrb[12].mxu0  ;;  %v1104_v44 = vpop.f32.mrb[12].mxu1 }
 0x4cb   :  { %v1064_v60 = vadd.f32 %v1063_v41, %v1012_v27  ;;  %v1105_v47 = vadd.f32 %v1104_v44, %v1012_v27  ;;  %v1065_v62 = vpop.f32.mrb[13].mxu0  ;;  %v1106_v63 = vpop.f32.mrb[13].mxu1 }
 0x4cc   :  { %v1066_v4 = vadd.f32 %v1065_v62, %v1012_v27  ;;  %v1107_v5 = vadd.f32 %v1106_v63, %v1012_v27  ;;  %v1067_v7 = vpop.f32.mrb[14].mxu0  ;;  %v1108_v32 = vpop.f32.mrb[14].mxu1 }
 0x4cd   :  { %v1115_v28 = vrot.slane %v1064_v60, 4  ;;  %v1117_v8 = vrot.slane %v1105_v47, 4  ;;  %v1068_v9 = vpop.f32.mrb[15].mxu0  ;;  %v1109_v50 = vpop.f32.mrb[15].mxu1  ;;  %v2480_v47 = vld [vmem:[%s4082_s2 + $0x8] sm:$0xf] }
 0x4ce   :  { %v1116_v14 = vrot.slane %v1066_v4, 4  ;;  %v1118_v57 = vrot.slane %v1107_v5, 4  ;;  %v1202_v62 = vpop.permute.xlu0 %1201 }
 0x4cf   :  { %1123 = vst [vmem:[%s4080_s7 + $0x20] sm:$0xf0] %v1115_v28  ;;  %1125 = vst [vmem:[%s4080_s7 + $0x30] sm:$0xf0] %v1117_v8 }
 0x4d0   :  { %1124 = vst [vmem:[%s4080_s7 + $0x28] sm:$0xf0] %v1116_v14  ;;  %1126 = vst [vmem:[%s4080_s7 + $0x38] sm:$0xf0] %v1118_v57 }
 0x4d6   :  { %v1127_v61 = vld [vmem:[%s4080_s7 + $0x20] sm:$0xf0]  ;;  %v1129_v48 = vld [vmem:[%s4080_s7 + $0x30] sm:$0xf0] }
 0x4d7   :  { %v1128_v24 = vld [vmem:[%s4080_s7 + $0x28] sm:$0xf0]  ;;  %v1130_v52 = vld [vmem:[%s4080_s7 + $0x38] sm:$0xf0]  ;;  %v1151_v55 = vmul.f32 %v1146_v13, %v1127_v61  ;;  %v1153_v25 = vmul.f32 %v1146_v13, %v1129_v48 }
 0x4d8   :  { %v1152_v43 = vmul.f32 %v1146_v13, %v1128_v24  ;;  %v1154_v56 = vmul.f32 %v1146_v13, %v1130_v52  ;;  %v2540_v52 = vld [vmem:[%s4083_s0 + $0x48] sm:$0xff] }
 0x4d9   :  { %v1175_v53 = vadd.f32 %v1170_v0, %v1151_v55  ;;  %v1177_v29 = vadd.f32 %v1170_v0, %v1153_v25  ;;  %v2487_v55 = vld [vmem:[%s4084_s5 + $0x8] sm:$0xf]  ;;  %v2545_v25 = vld [vmem:[%s4081_s3 + $0x18] sm:$0xff] }
 0x4da   :  { %v1176_v30 = vadd.f32 %v1170_v0, %v1152_v43  ;;  %v1178_v34 = vadd.f32 %v1170_v0, %v1154_v56  ;;  %v2556_v43 = vld [vmem:[%s4083_s0 + $0x68] sm:$0xff]  ;;  %v2555_v56 = vld [vmem:[%s4083_s0 + $0x60] sm:$0xff] }
 0x4db   :  { %v1183_v45 = vmax.f32 %v1175_v53, 0.0  ;;  %v1185_v46 = vmax.f32 %v1177_v29, 0.0  ;;  %v2558_v53 = vld [vmem:[%s4085_s1 + $0x60] sm:$0xff]  ;;  %v2557_v29 = vld [vmem:[%s4083_s0 + $0x70] sm:$0xf] }
 0x4dc   :  { %v1184_v39 = vmax.f32 %v1176_v30, 0.0  ;;  %v1186_v54 = vmax.f32 %v1178_v34, 0.0  ;;  %v2560_v30 = vld [vmem:[%s4085_s1 + $0x70] sm:$0xf]  ;;  %v2559_v34 = vld [vmem:[%s4085_s1 + $0x68] sm:$0xff] }
 0x4dd   :  { %v1193_v11 = vpack.c.bf16 %v1187_v33, %v1183_v45  ;;  %v1195_v31 = vpack.c.bf16 %v1189_v38, %v1185_v46  ;;  %v2562_v45 = vld [vmem:[%s4081_s3 + $0x20] sm:$0xff]  ;;  %v2568_v33 = vld [vmem:[%s4084_s5 + $0x10] sm:$0xf]  ;;  %v2842_v46 = vpop.permute.xlu1 %2841  ;;  %v2847_v38 = vpop.permute.xlu0 %2846 }
 0x4de   :  { %v1194_v26 = vpack.c.bf16 %v1188_v23, %v1184_v39  ;;  %v1196_v27 = vpack.c.bf16 %v1190_v42, %v1186_v54 }
 0x4df   :  { %v1208_v35 = vrot.slane %v1193_v11, 2  ;;  %v1210_v37 = vrot.slane %v1195_v31, 2 }
 0x4e0   :  { %v1209_v51 = vrot.slane %v1194_v26, 2  ;;  %v1211_v41 = vrot.slane %v1196_v27, 2 }
 0x4e1   :  { %v1218_v44 = vsel %vm4096_vm3, %v1208_v35, 0  ;;  %v1224_v60 = vsel %vm4096_vm3, %v1210_v37, 0  ;;  %v3729_v23 = vpop.permute.xlu1 %2851  ;;  %v3731_v42 = vpop.permute.xlu0 %2856  ;;  %v2844_v35 = vunpack.i.h.bf16 %v2842_v46  ;;  %v2843_v37 = vunpack.i.l.bf16 %v2842_v46 }
 0x4e2   :  { %2482 = vmatprep.subr.msk.bf16.mxu0 %vm4096_vm3, %v1209_v51  ;;  %2484 = vmatprep.subr.msk.bf16.mxu1 %vm4096_vm3, %v1211_v41  ;;  %v2849_v51 = vunpack.i.h.bf16 %v2847_v38  ;;  %vm1467_vm3 = vcmask 949248  }
 0x4e3   :  { %1230 = vmatpush1.bf16.msra.mxu0 %v1218_v44  ;;  %1271 = vmatpush1.bf16.msra.mxu1 %v1224_v60 }
 0x4e5   :  { %v3733_v39 = vpop.permute.xlu1 %2866  ;;  %v3735_v54 = vpop.permute.xlu0 %2861 }
 0x4e6   :  { %2483 = vmatmul.mubr.msk.bf16.vlgmr.msra.gmra.mrb[16].mxu0 %vm1212_vm4, %v2480_v47  ;;  %2485 = vmatmul.mubr.msk.bf16.vlgmr.msra.gmra.mrb[16].mxu1 %vm1212_vm4, %v2480_v47 }
 0x4e7   :  { %1639 = vmatprep.mubr.bf16.mxu0 %v2962_v2  ;;  %1680 = vmatprep.mubr.bf16.mxu1 %v2962_v2 }
 0x4e9   :  { %v3737_v11 = vpop.permute.xlu1 %2876  ;;  %v3739_v31 = vpop.permute.xlu0 %2871 }
 0x5b9   :  { %v1263_v63 = vpop.f32.mrb[16].mxu0  ;;  %v1304_v4 = vpop.f32.mrb[16].mxu1 }
 0x5ba   :  { %v1264_v5 = vadd.f32 %v1263_v63, %v1202_v62  ;;  %v1305_v7 = vadd.f32 %v1304_v4, %v1202_v62  ;;  %v1265_v32 = vpop.f32.mrb[17].mxu0  ;;  %v1306_v28 = vpop.f32.mrb[17].mxu1  ;;  %v2869_v63 = vunpack.i.h.bf16 %v3733_v39  ;;  %v2868_v4 = vunpack.i.l.bf16 %v3733_v39 }
 0x5bb   :  { %v1267_v8 = vpop.f32.mrb[18].mxu0  ;;  %v1308_v9 = vpop.f32.mrb[18].mxu1  ;;  %v1307_v18 = vadd.f32 %v1306_v28, %v1202_v62  ;;  %v1266_v59 = vadd.f32 %v1265_v32, %v1202_v62  ;;  %v2848_v62 = vunpack.i.l.bf16 %v2847_v38  ;;  %v3748_v32 = vadd.s32 12, %v3130_v1 }
 0x5bc   :  { %v3640_v50 = vmax.f32 %v1264_v5, 0.0  ;;  %v3642_v10 = vmax.f32 %v1305_v7, 0.0  ;;  %v1268_v14 = vpop.f32.mrb[19].mxu0  ;;  %v1309_v57 = vpop.f32.mrb[19].mxu1 }
 0x5bd   :  { %v3652_v0 = vmax.f32 %v1307_v18, 0.0  ;;  %v3656_v19 = vmax.f32 %v1266_v59, 0.0  ;;  %vm4101_vm14 = vcmp.lt.s32.totalorder %v3748_v32, 16 }
 0x5be   :  { %v2885_v12 = vpack.i.bf16 %v3642_v10, %v2963_v6  ;;  %v2880_v13 = vpack.i.bf16 %v3640_v50, %v2963_v6  ;;  %v2910_v21 = vpack.i.bf16 %v3642_v10, %v3640_v50  ;;  %vm3828_vm5 = vmpackc.low %vm1330_vm9, %vm4101_vm14 }
 0x5bf   :  { %v2920_v20 = vpack.i.bf16 %v3652_v0, %v3642_v10  ;;  %v2930_v22 = vpack.i.bf16 %v2963_v6, %v3652_v0  ;;  %v2915_v36 = vpack.i.bf16 %v3656_v19, %v3640_v50  ;;  %v2935_v61 = vpack.i.bf16 %v3652_v0, %v3656_v19  ;;  %vm3852_vm9 = vmpackc.low %vm4101_vm14, %vm2972_vm7 }
 0x5c0   :  { %2886 = vrot.lane.b32.xlu0 %v2885_v12, %s2982_s12  ;;  %2881 = vrot.lane.b32.xlu1 %v2880_v13, %s2982_s12  ;;  %v2925_v48 = vpack.i.bf16 %v2963_v6, %v3656_v19  ;;  %v2950_v24 = vpack.i.bf16 %v3652_v0, %v2963_v6 }
 0x5c4   :  { %2896 = vrot.lane.b32.xlu0 %v2885_v12, %s2981_s11  ;;  %2891 = vrot.lane.b32.xlu1 %v2880_v13, %s2981_s11 }
 0x5c8   :  { %2906 = vrot.lane.b32.xlu0 %v2885_v12, %s2984_s14  ;;  %2901 = vrot.lane.b32.xlu1 %v2880_v13, %s2984_s14 }
 0x5cc   :  { %2921 = vrot.lane.b32.xlu0 %v2920_v20, %s2983_s13  ;;  %2911 = vrot.lane.b32.xlu1 %v2910_v21, %s2985_s6 }
 0x5d0   :  { %2931 = vrot.lane.b32.xlu0 %v2930_v22, %s2985_s6  ;;  %2916 = vrot.lane.b32.xlu1 %v2915_v36, %s2983_s13 }
 0x5d4   :  { %2936 = vrot.lane.b32.xlu0 %v2935_v61, %s2982_s12  ;;  %2926 = vrot.lane.b32.xlu1 %v2925_v48, %s2985_s6 }
 0x5d8   :  { %2946 = vrot.lane.b32.xlu0 %v2925_v48, %s2984_s14  ;;  %2941 = vrot.lane.b32.xlu1 %v2935_v61, %s2981_s11 }
 0x5dc   :  { %2956 = vrot.lane.b32.xlu0 %v2963_v6, %s2984_s14  ;;  %2951 = vrot.lane.b32.xlu1 %v2950_v24, %s2984_s14  ;;  %v2541_v6 = vld [vmem:[%s4083_s0 + $0x50] sm:$0xff] }
 0x5e0   :  { %1706 = vperm.xlu0 %2598, %v2540_v52   ;;  %1589 = vperm.xlu1 %2719, %v2487_v55  }
 0x5e4   :  { %1727 = vperm.xlu0 %2598, %v2542_v58   ;;  %1711 = vperm.xlu1 %2719, %v2541_v6  }
 0x5e8   :  { %1761 = vperm.xlu0 %2598, %v2545_v25   ;;  %1732 = vperm.xlu1 %2719, %v2543_v40   ;;  %v2854_v40 = vunpack.i.h.bf16 %v3729_v23 }
 0x5ec   :  { %1864 = vperm.xlu0 %2598, %v2549_v49   ;;  %1875 = vrot.lane.b32.xlu1 %v2550_v17, %s2974_s19  ;;  %v2853_v49 = vunpack.i.l.bf16 %v3729_v23  ;;  %v2859_v17 = vunpack.i.h.bf16 %v3731_v42  ;;  %v2878_v23 = vunpack.i.l.bf16 %v3737_v11 }
 0x5f0   :  { %2012 = vperm.xlu0 %2598, %v2556_v43   ;;  %2008 = vperm.xlu1 %2719, %v2555_v56   ;;  %v3790_v56 = vadd.s32 12, %v3132_v3 }
 0x5f2   :  { %vm1325_vm1 = vcmp.lt.s32.totalorder %v3790_v56, 16 }
 0x5f3   :  { %vm3836_vm2 = vmpackc.low %vm1329_vm11, %vm1325_vm1  ;;  %vm4150_vm11 = vcmp.ge.s32.totalorder %v3139_v15, 12 }
 0x5f4   :  { %2044 = vperm.xlu0 %2598, %v2558_v53   ;;  %2016 = vperm.xlu1 %2719, %v2557_v29   ;;  %v2858_v53 = vunpack.i.l.bf16 %v3731_v42  ;;  %v2864_v29 = vunpack.i.h.bf16 %v3735_v54 }
 0x5f8   :  { %2052 = vperm.xlu0 %2598, %v2560_v30   ;;  %2048 = vperm.xlu1 %2719, %v2559_v34   ;;  %v2863_v30 = vunpack.i.l.bf16 %v3735_v54  ;;  %v3800_v34 = vadd.s32 12, %v3139_v15 }
 0x5fc   :  { %2100 = vperm.xlu1 %2719, %v2562_v45   ;;  %v3805_v45 = vsel %vm4097_vm10, %v2868_v4, %v2869_v63 }
 0x600   :  { %2240 = vperm.xlu1 %2719, %v2568_v33   ;;  %v2879_v33 = vunpack.i.h.bf16 %v3737_v11 }
 0x632   :  { %v2887_v26 = vpop.permute.xlu0 %2886  ;;  %v2882_v27 = vpop.permute.xlu1 %2881 }
 0x633   :  { %v2889_v41 = vunpack.i.h.bf16 %v2887_v26  ;;  %v2888_v44 = vunpack.i.l.bf16 %v2887_v26  ;;  %v2884_v60 = vunpack.i.h.bf16 %v2882_v27  ;;  %v2883_v47 = vunpack.i.l.bf16 %v2882_v27 }
 0x634   :  { %v3815_v27 = vadd.s32 12, %v3141_v16 }
 0x635   :  { %v1360_v57 = vsel %vm4097_vm10, %v2844_v35, %v2888_v44  ;;  %v1361_v12 = vsel %vm4097_vm10, %v2888_v44, %v2889_v41  ;;  %v1347_v13 = vsel %vm4097_vm10, %v2843_v37, %v2883_v47  ;;  %v1348_v18 = vsel %vm4097_vm10, %v2883_v47, %v2884_v60 }
 0x636   :  { %v2897_v5 = vpop.permute.xlu0 %2896  ;;  %v2892_v7 = vpop.permute.xlu1 %2891  ;;  %v2874_v35 = vunpack.i.h.bf16 %v3739_v31  ;;  %vm1323_vm10 = vcmp.lt.s32.totalorder %v3815_v27, 16 }
 0x637   :  { %v2899_v28 = vunpack.i.h.bf16 %v2897_v5  ;;  %v2898_v8 = vunpack.i.l.bf16 %v2897_v5  ;;  %v2894_v9 = vunpack.i.h.bf16 %v2892_v7  ;;  %v2893_v14 = vunpack.i.l.bf16 %v2892_v7 }
 0x639   :  { %v1393_v20 = vsel %vm1382_vm6, %v2849_v51, %v2898_v8  ;;  %v1394_v21 = vsel %vm1382_vm6, %v2898_v8, %v2899_v28  ;;  %v1383_v22 = vsel %vm1382_vm6, %v2848_v62, %v2893_v14  ;;  %v1384_v36 = vsel %vm1382_vm6, %v2893_v14, %v2894_v9 }
 0x63a   :  { %v2515_v48 = vpack.c.bf16 %v1394_v21, %v1361_v12  ;;  %v2518_v24 = vpack.c.bf16 %v1393_v20, %v1360_v57  ;;  %v2489_v52 = vpack.c.bf16 %v1384_v36, %v1348_v18  ;;  %v2492_v55 = vpack.c.bf16 %v1383_v22, %v1347_v13  ;;  %v2907_v58 = vpop.permute.xlu0 %2906  ;;  %v2902_v6 = vpop.permute.xlu1 %2901 }
 0x63b   :  { %v2909_v46 = vunpack.i.h.bf16 %v2907_v58  ;;  %v2908_v38 = vunpack.i.l.bf16 %v2907_v58  ;;  %v2904_v41 = vunpack.i.h.bf16 %v2902_v6  ;;  %v2903_v44 = vunpack.i.l.bf16 %v2902_v6 }
 0x63c   :  { %2490 = vmatprep.subr.msk.bf16.mxu0 %vm3757_vm0, %v2489_v52  ;;  %2516 = vmatprep.subr.msk.bf16.mxu1 %vm3768_vm15, %v2515_v48  ;;  %v1536_v20 = vsel %vm1382_vm6, %v2878_v23, %v2879_v33  ;;  %v2873_v21 = vunpack.i.l.bf16 %v3739_v31 }
 0x63d   :  { %2493 = vmatpush1.bf16.msk.msra.mxu0 %vm3775_vm12, %v2492_v55  ;;  %2519 = vmatpush1.bf16.msk.msra.mxu1 %vm3785_vm8, %v2518_v24  ;;  %v1414_v60 = vsel %vm4100_vm13, %v2854_v40, %v2908_v38  ;;  %v1415_v47 = vsel %vm4100_vm13, %v2908_v38, %v2909_v46  ;;  %v1404_v22 = vsel %vm4100_vm13, %v2853_v49, %v2903_v44 }
 0x63e   :  { %v2922_v42 = vpop.permute.xlu0 %2921  ;;  %v2912_v26 = vpop.permute.xlu1 %2911  ;;  %v1405_v3 = vsel %vm4100_vm13, %v2903_v44, %v2904_v41 }
 0x63f   :  { %v2924_v37 = vunpack.i.h.bf16 %v2922_v42  ;;  %v2923_v51 = vunpack.i.l.bf16 %v2922_v42  ;;  %v2914_v8 = vunpack.i.h.bf16 %v2912_v26 }
 0x641   :  { %v1450_v62 = vsel %vm1212_vm4, %v2859_v17, %v2923_v51  ;;  %v1451_v63 = vsel %vm1212_vm4, %v2923_v51, %v2924_v37 }
 0x642   :  { %v2521_v7 = vpack.c.bf16 %v1451_v63, %v1415_v47  ;;  %v2524_v28 = vpack.c.bf16 %v1450_v62, %v1414_v60  ;;  %v2932_v9 = vpop.permute.xlu0 %2931  ;;  %v2917_v14 = vpop.permute.xlu1 %2916 }
 0x643   :  { %v2934_v1 = vunpack.i.h.bf16 %v2932_v9  ;;  %v2933_v12 = vunpack.i.l.bf16 %v2932_v9  ;;  %v2919_v13 = vunpack.i.h.bf16 %v2917_v14  ;;  %v2918_v18 = vunpack.i.l.bf16 %v2917_v14 }
 0x644   :  { %2522 = vmatprep.subr.msk.bf16.mxu1 %vm3828_vm5, %v2521_v7  ;;  %vm4149_vm5 = vcmp.lt.s32.totalorder %v3800_v34, 16 }
 0x645   :  { %v1479_v48 = vsel %vm1467_vm3, %v2914_v8, %v2933_v12  ;;  %v1480_v24 = vsel %vm1467_vm3, %v2933_v12, %v2934_v1  ;;  %v1439_v31 = vsel %vm1212_vm4, %v2858_v53, %v2918_v18  ;;  %v1440_v52 = vsel %vm1212_vm4, %v2918_v18, %v2919_v13  ;;  %2525 = vmatpush1.bf16.msk.msra.mxu1 %vm3836_vm2, %v2524_v28  ;;  %vm2494_vm13 = vmpackc.low %vm4150_vm11, %vm4149_vm5 }
 0x646   :  { %v2527_v55 = vpack.c.bf16 %v1480_v24, %v3652_v0  ;;  %v2530_v58 = vpack.c.bf16 %v1479_v48, %v3642_v10  ;;  %v2495_v6 = vpack.c.bf16 %v1440_v52, %v1405_v3  ;;  %v2498_v40 = vpack.c.bf16 %v1439_v31, %v1404_v22  ;;  %v2937_v49 = vpop.permute.xlu0 %2936  ;;  %v2927_v17 = vpop.permute.xlu1 %2926  ;;  %vm2529_vm2 = vmpackc.low %vm1325_vm1, %vm2972_vm7 }
 0x647   :  { %vm4151_vm4 = vcmp.ge.s32.totalorder %v3141_v16, 12  ;;  %v2913_v53 = vunpack.i.l.bf16 %v2912_v26  ;;  %v2929_v33 = vunpack.i.h.bf16 %v2927_v17  ;;  %v2928_v46 = vunpack.i.l.bf16 %v2927_v17  ;;  %v3955_v17 = vld [vmem:[%s4080_s7 + $0x48] sm:$0xff] }
 0x648   :  { %vm2497_vm14 = vmpackc.low %vm4151_vm4, %vm1323_vm10  ;;  %vm4152_vm5 = vcmask 621568   ;;  %v1526_v10 = vsel %vm1382_vm6, %v2873_v21, %v2874_v35  ;;  %v2939_v0 = vunpack.i.h.bf16 %v2937_v49  ;;  %2496 = vmatprep.subr.msk.bf16.mxu0 %vm2494_vm13, %v2495_v6  ;;  %2528 = vmatprep.subr.msk.bf16.mxu1 %vm3852_vm9, %v2527_v55  ;;  %v2533_v16 = vpack.c.bf16 %v1536_v20, %v3805_v45 }
 0x649   :  { %v1499_v15 = vsel %vm4152_vm5, %v2863_v30, %v2864_v29  ;;  %v2938_v38 = vunpack.i.l.bf16 %v2937_v49  ;;  %v1468_v42 = vsel %vm1467_vm3, %v2913_v53, %v2928_v46  ;;  %v1469_v26 = vsel %vm1467_vm3, %v2928_v46, %v2929_v33  ;;  %2499 = vmatpush1.bf16.msk.msra.mxu0 %vm2497_vm14, %v2498_v40  ;;  %2531 = vmatpush1.bf16.msk.msra.mxu1 %vm2529_vm2, %v2530_v58  ;;  %vm2503_vm13 = vmpackc.low %vm1323_vm10, %vm2972_vm7  ;;  %v3950_v49 = vld [vmem:[%s4080_s7 + $0x40] sm:$0xff]  ;;  %v3960_v53 = vld [vmem:[%s4080_s7 + $0x58] sm:$0xff] }
 0x64a   :  { %vm4153_vm11 = vcmp.lt.s32.totalorder %v3800_v34, 16  ;;  %v2501_v29 = vpack.c.bf16 %v1469_v26, %v3656_v19  ;;  %v2504_v35 = vpack.c.bf16 %v1468_v42, %v3640_v50  ;;  %v2947_v37 = vpop.permute.xlu0 %2946  ;;  %v2942_v51 = vpop.permute.xlu1 %2941  ;;  %2534 = vmatprep.subr.msk.bf16.mxu1 %vm3768_vm15, %v2533_v16  ;;  %v2507_v47 = vpack.c.bf16 %v1526_v10, %v1499_v15  ;;  %vm4154_vm3 = vmmov %vm4152_vm5  ;;  %v3965_v46 = vld [vmem:[%s4080_s7 + $0x50] sm:$0xff] }
 0x64b   :  { %vm2500_vm4 = vmpackc.low %vm4153_vm11, %vm2972_vm7  ;;  %v2949_v45 = vunpack.i.h.bf16 %v2947_v37  ;;  %v2948_v41 = vunpack.i.l.bf16 %v2947_v37  ;;  %v2944_v44 = vunpack.i.h.bf16 %v2942_v51  ;;  %v2943_v60 = vunpack.i.l.bf16 %v2942_v51 }
 0x64c   :  { %v1511_v19 = vsel %vm4154_vm3, %v2939_v0, %v2868_v4  ;;  %2502 = vmatprep.subr.msk.bf16.mxu0 %vm2500_vm4, %v2501_v29  ;;  %vm4155_vm14 = vmmov %vm4154_vm3  ;;  %vm4156_vm9 = vcmask 424960   ;;  %vm1764_vm4 = vcmask 130048  }
 0x64d   :  { %v1498_v50 = vsel %vm4155_vm14, %v2938_v38, %v2863_v30  ;;  %v1545_v62 = vsel %vm4156_vm9, %v2948_v41, %v2949_v45  ;;  %v1535_v63 = vsel %vm1382_vm6, %v2944_v44, %v2878_v23  ;;  %v1525_v5 = vsel %vm1382_vm6, %v2943_v60, %v2873_v21  ;;  %2505 = vmatpush1.bf16.msk.msra.mxu0 %vm2503_vm13, %v2504_v35  ;;  %vm4157_vm7 = vmmov %vm4156_vm9 }
 0x64e   :  { %v2536_v61 = vpack.c.bf16 %v1535_v63, %v1511_v19  ;;  %v2510_v7 = vpack.c.bf16 %v1525_v5, %v1498_v50  ;;  %v2957_v28 = vpop.permute.xlu0 %2956  ;;  %v2952_v39 = vpop.permute.xlu1 %2951  ;;  %2508 = vmatprep.subr.msk.bf16.mxu0 %vm3757_vm0, %v2507_v47  ;;  %v1559_v54 = vsel %vm1323_vm10, %v1545_v62, 0.0  ;;  %vm4158_vm6 = vmmov %vm4157_vm7  ;;  %vm4160_vm0 = vcmp.lt.s32.totalorder %v3748_v32, 16  ;;  %v2486_v32 = vld [vmem:[%s4086_s4 + $0x4] sm:$0x3] }
 0x64f   :  { %v2959_v4 = vunpack.i.h.bf16 %v2957_v28  ;;  %v2958_v30 = vunpack.i.l.bf16 %v2957_v28  ;;  %v2954_v8 = vunpack.i.h.bf16 %v2952_v39  ;;  %v2953_v9 = vunpack.i.l.bf16 %v2952_v39  ;;  %vm4159_vm15 = vmmov %vm4158_vm6 }
 0x650   :  { %2537 = vmatpush1.bf16.msk.msra.mxu1 %vm3785_vm8, %v2536_v61  ;;  %v1579_v59 = vpack.c.bf16 %v1559_v54, %v1559_v54  ;;  %vm4161_vm10 = vmmov %vm4153_vm11  ;;  %vm4162_vm8 = vcmask 1043456   ;;  %vm4166_vm11 = vcmask 588800  }
 0x651   :  { %v1556_v11 = vsel %vm4157_vm7, %v2958_v30, %v2959_v4  ;;  %v1555_v23 = vsel %vm4158_vm6, %v2954_v8, %v2958_v30  ;;  %v1546_v14 = vsel %vm4159_vm15, %v2949_v45, %v2953_v9  ;;  %2511 = vmatpush1.bf16.msk.msra.mxu0 %vm3775_vm12, %v2510_v7  ;;  %vm4163_vm2 = vmmov %vm4162_vm8  ;;  %vm4172_vm7 = vcmask 64512  }
 0x652   :  { %v1562_v27 = vsel %vm4160_vm0, %v1556_v11, 0.0  ;;  %v1560_v57 = vsel %vm4161_vm10, %v1546_v14, 0.0  ;;  %v1561_v43 = vsel %vm1325_vm1, %v1555_v23, 0.0  ;;  %vm4164_vm5 = vmmov %vm4163_vm2 }
 0x653   :  { %v1580_v1 = vpack.c.bf16 %v1560_v57, %v1560_v57  ;;  %v1582_v12 = vpack.c.bf16 %v1562_v27, %v1562_v27  ;;  %v1581_v13 = vpack.c.bf16 %v1561_v43, %v1561_v43  ;;  %v1596_v25 = vsel %vm4164_vm5, %v1579_v59, 0  ;;  %vm4165_vm12 = vmmov %vm4163_vm2  ;;  %v2544_v59 = vld [vmem:[%s4082_s2 + $0xc] sm:$0xf] }
 0x654   :  { %vm4167_vm1 = vmmov %vm4166_vm11 }
 0x655   :  { %2512 = vmatprep.subr.msk.bf16.mxu0 %vm4162_vm8, %v1580_v1  ;;  %2538 = vmatprep.subr.msk.bf16.mxu1 %vm4163_vm2, %v1582_v12  ;;  %v1602_v18 = vsel %vm4165_vm12, %v1581_v13, 0  ;;  %vm4168_vm13 = vmmov %vm4163_vm2 }
 0x656   :  { %1616 = vmatpush1.bf16.msra.mxu0 %v1596_v25  ;;  %1657 = vmatpush1.bf16.msra.mxu1 %v1602_v18  ;;  %vm4169_vm3 = vmmov %vm4163_vm2 }
 0x657   :  { %vm4170_vm14 = vmmov %vm4163_vm2 }
 0x658   :  { %vm4171_vm9 = vmmov %vm4163_vm2 }
 0x659   :  { %2513 = vmatmul.mubr.msk.bf16.vlgmr.msra.gmra.mrb[20].mxu0 %vm4166_vm11, %v2486_v32  ;;  %2539 = vmatmul.mubr.msk.bf16.vlgmr.msra.gmra.mrb[20].mxu1 %vm4167_vm1, %v2486_v32  ;;  %vm4173_vm6 = vmmov %vm4172_vm7  ;;  %vm4182_vm1 = vcmask 1041408  }
 0x65a   :  { %1800 = vmatprep.mubr.bf16.mxu0 %v2962_v2  ;;  %1841 = vmatprep.mubr.bf16.mxu1 %v2962_v2  ;;  %vm4174_vm15 = vmmov %vm4163_vm2 }
 0x65b   :  { %vm4175_vm0 = vmmov %vm4163_vm2  ;;  %vm4178_vm2 = vcmask 1045504  }
 0x65c   :  { %vm4176_vm10 = vmmov %vm4175_vm0 }
 0x65d   :  { %vm4177_vm8 = vmmov %vm4175_vm0 }
 0x65e   :  { %vm4179_vm5 = vmmov %vm4178_vm2 }
 0x65f   :  { %v1590_v56 = vpop.permute.xlu1 %1589  ;;  %v1707_v40 = vpop.permute.xlu0 %1706  ;;  %vm4180_vm12 = vmmov %vm4178_vm2 }
 0x660   :  { %vm4181_vm11 = vmmov %vm4178_vm2 }
 0x663   :  { %v1712_v34 = vpop.permute.xlu1 %1711  ;;  %v1728_v51 = vpop.permute.xlu0 %1727 }
 0x664   :  { %v1719_v15 = vmul.f32 %v1712_v34, %v3955_v17  ;;  %v1721_v10 = vmul.f32 %v1712_v34, %v3960_v53  ;;  %v1718_v38 = vmul.f32 %v1712_v34, %v3950_v49  ;;  %v1720_v42 = vmul.f32 %v1712_v34, %v3965_v46 }
 0x667   :  { %v1733_v33 = vpop.permute.xlu1 %1732  ;;  %v1762_v27 = vpop.permute.xlu0 %1761 }
 0x668   :  { %v1740_v45 = vadd.f32 %v1733_v33, %v1719_v15  ;;  %v1742_v41 = vadd.f32 %v1733_v33, %v1721_v10  ;;  %v1739_v47 = vadd.f32 %v1733_v33, %v1718_v38  ;;  %v1741_v19 = vadd.f32 %v1733_v33, %v1720_v42  ;;  %v2569_v33 = vld.sshfl [vmem:[%s4086_s4 + $0x8] sm:$0x3 pattern:$0x76325410] }
 0x669   :  { %2251 = vrot.lane.b32.xlu0 %v2569_v33, %s2974_s19 }
 0x66a   :  { %v1748_v39 = vmax.f32 %v1740_v45, 0.0  ;;  %v1750_v4 = vmax.f32 %v1742_v41, 0.0  ;;  %v1747_v30 = vmax.f32 %v1739_v47, 0.0  ;;  %v1749_v8 = vmax.f32 %v1741_v19, 0.0 }
 0x66b   :  { %v1865_v15 = vpop.permute.xlu0 %1864 }
 0x66f   :  { %v2013_v10 = vpop.permute.xlu0 %2012 }
 0x670   :  { %v2019_v41 = vrot.slane %v2013_v10, 4 }
 0x673   :  { %v2045_v42 = vpop.permute.xlu0 %2044 }
 0x72c   :  { %v1641_v20 = vpop.f32.mrb[20].mxu0  ;;  %v1682_v21 = vpop.f32.mrb[20].mxu1 }
 0x72d   :  { %v1642_v22 = vadd.f32 %v1641_v20, %v1590_v56  ;;  %v1683_v3 = vadd.f32 %v1682_v21, %v1590_v56  ;;  %v1643_v36 = vpop.f32.mrb[21].mxu0  ;;  %v1684_v48 = vpop.f32.mrb[21].mxu1 }
 0x72e   :  { %v1644_v24 = vadd.f32 %v1643_v36, %v1590_v56  ;;  %v1685_v31 = vadd.f32 %v1684_v48, %v1590_v56  ;;  %v1645_v52 = vpop.f32.mrb[22].mxu0  ;;  %v1686_v55 = vpop.f32.mrb[22].mxu1 }
 0x72f   :  { %1689 = vst [vmem:[%s4080_s7 + $0x20] sm:$0xf] %v1642_v22  ;;  %1691 = vst [vmem:[%s4080_s7 + $0x30] sm:$0xf] %v1683_v3  ;;  %v1646_v58 = vpop.f32.mrb[23].mxu0  ;;  %v1687_v6 = vpop.f32.mrb[23].mxu1 }
 0x730   :  { %1690 = vst [vmem:[%s4080_s7 + $0x28] sm:$0xf] %v1644_v24  ;;  %1692 = vst [vmem:[%s4080_s7 + $0x38] sm:$0xf] %v1685_v31 }
 0x736   :  { %v3972_v0 = vld [vmem:[%s4080_s7 + $0x20] sm:$0xff]  ;;  %v3977_v16 = vld [vmem:[%s4080_s7 + $0x30] sm:$0xff] }
 0x737   :  { %v3984_v26 = vld [vmem:[%s4080_s7 + $0x28] sm:$0xff]  ;;  %v3989_v29 = vld [vmem:[%s4080_s7 + $0x38] sm:$0xff]  ;;  %v1714_v35 = vmul.f32 %v1707_v40, %v3972_v0  ;;  %v1716_v37 = vmul.f32 %v1707_v40, %v3977_v16 }
 0x738   :  { %v1715_v44 = vmul.f32 %v1707_v40, %v3984_v26  ;;  %v1717_v60 = vmul.f32 %v1707_v40, %v3989_v29  ;;  %v1876_v40 = vpop.permute.xlu1 %1875 }
 0x739   :  { %v1735_v50 = vadd.f32 %v1728_v51, %v1714_v35  ;;  %v1737_v62 = vadd.f32 %v1728_v51, %v1716_v37  ;;  %v2053_v37 = vpop.permute.xlu0 %2052 }
 0x73a   :  { %v1736_v63 = vadd.f32 %v1728_v51, %v1715_v44  ;;  %v1738_v5 = vadd.f32 %v1728_v51, %v1717_v60  ;;  %v2057_v44 = vrot.slane %v2053_v37, 4 }
 0x73b   :  { %v1743_v61 = vmax.f32 %v1735_v50, 0.0  ;;  %v1745_v7 = vmax.f32 %v1737_v62, 0.0 }
 0x73c   :  { %v1744_v28 = vmax.f32 %v1736_v63, 0.0  ;;  %v1746_v54 = vmax.f32 %v1738_v5, 0.0  ;;  %v2009_v38 = vpop.permute.xlu1 %2008 }
 0x73d   :  { %v1753_v23 = vpack.c.bf16 %v1747_v30, %v1743_v61  ;;  %v1755_v14 = vpack.c.bf16 %v1749_v8, %v1745_v7 }
 0x73e   :  { %v1754_v9 = vpack.c.bf16 %v1748_v39, %v1744_v28  ;;  %v1756_v11 = vpack.c.bf16 %v1750_v4, %v1746_v54 }
 0x740   :  { %1768 = vmatprep.subr.bf16.mxu0 %v1754_v9  ;;  %1809 = vmatprep.subr.bf16.mxu1 %v1756_v11  ;;  %v2017_v35 = vpop.permute.xlu1 %2016  ;;  %v2018_v11 = vrot.slane %v2009_v38, 4 }
 0x741   :  { %1769 = vmatpush1.bf16.msra.mxu0 %v1753_v23  ;;  %1810 = vmatpush1.bf16.msra.mxu1 %v1755_v14  ;;  %v2021_v45 = vrot.slane %v2017_v35, 4 }
 0x743   :  { %v2022_v61 = vsel %vm4174_vm15, %v2019_v41, %v2021_v45  ;;  %vm4189_vm15 = vmmov %vm4175_vm0 }
 0x744   :  { %2546 = vmatmul.mubr.msk.bf16.vlgmr.msra.gmra.mrb[24].mxu0 %vm1764_vm4, %v2544_v59  ;;  %2547 = vmatmul.mubr.msk.bf16.vlgmr.msra.gmra.mrb[24].mxu1 %vm1764_vm4, %v2544_v59  ;;  %v2049_v51 = vpop.permute.xlu1 %2048  ;;  %vm4183_vm4 = vmmov %vm4182_vm1 }
 0x745   :  { %1924 = vmatprep.mubr.bf16.mxu0 %v2962_v2  ;;  %1965 = vmatprep.mubr.bf16.mxu1 %v2962_v2  ;;  %v2055_v60 = vrot.slane %v2049_v51, 4 }
 0x747   :  { %v2058_v23 = vsel %vm4175_vm0, %v2055_v60, %v2057_v44 }
 0x817   :  { %v1802_v57 = vpop.f32.mrb[24].mxu0  ;;  %v1843_v43 = vpop.f32.mrb[24].mxu1 }
 0x818   :  { %v1803_v1 = vadd.f32 %v1802_v57, %v1762_v27  ;;  %v1844_v12 = vadd.f32 %v1843_v43, %v1762_v27  ;;  %v1804_v13 = vpop.f32.mrb[25].mxu0  ;;  %v1845_v25 = vpop.f32.mrb[25].mxu1  ;;  %v2037_v57 = vmul.f32 %v2022_v61, %v3960_v53  ;;  %v2034_v43 = vmul.f32 %v2022_v61, %v3950_v49 }
 0x819   :  { %v1805_v18 = vadd.f32 %v1804_v13, %v1762_v27  ;;  %v1846_v32 = vadd.f32 %v1845_v25, %v1762_v27  ;;  %v1806_v56 = vpop.f32.mrb[26].mxu0  ;;  %v1847_v34 = vpop.f32.mrb[26].mxu1  ;;  %v2035_v27 = vmul.f32 %v2022_v61, %v3955_v17 }
 0x81a   :  { %v1850_v20 = vmax.f32 %v1803_v1, 0.0  ;;  %v1852_v21 = vmax.f32 %v1844_v12, 0.0  ;;  %v1807_v22 = vpop.f32.mrb[27].mxu0  ;;  %v1848_v3 = vpop.f32.mrb[27].mxu1  ;;  %v2036_v1 = vmul.f32 %v2022_v61, %v3965_v46  ;;  %v2073_v53 = vadd.f32 %v2058_v23, %v2037_v57 }
 0x81b   :  { %v1851_v36 = vmax.f32 %v1805_v18, 0.0  ;;  %v1853_v48 = vmax.f32 %v1846_v32, 0.0  ;;  %v2071_v17 = vadd.f32 %v2058_v23, %v2035_v27  ;;  %v2020_v12 = vsel %vm4176_vm10, %v2018_v11, %v2019_v41 }
 0x81c   :  { %v1856_v24 = vpack.c.bf16 %v1850_v20, %v1850_v20  ;;  %v1858_v31 = vpack.c.bf16 %v1852_v21, %v1852_v21  ;;  %v2070_v13 = vadd.f32 %v2058_v23, %v2034_v43  ;;  %v2072_v25 = vadd.f32 %v2058_v23, %v2036_v1  ;;  %v2561_v43 = vld [vmem:[%s4082_s2 + $0x10] sm:$0xf]  ;;  %v2101_v1 = vpop.permute.xlu1 %2100 }
 0x81d   :  { %v1857_v52 = vpack.c.bf16 %v1851_v36, %v1851_v36  ;;  %v1859_v55 = vpack.c.bf16 %v1853_v48, %v1853_v48  ;;  %v2030_v18 = vmul.f32 %v2020_v12, %v3972_v0  ;;  %v2032_v49 = vmul.f32 %v2020_v12, %v3977_v16 }
 0x81e   :  { %v1881_v58 = vsel %vm4168_vm13, %v1856_v24, 0  ;;  %v1887_v6 = vsel %vm4169_vm3, %v1858_v31, 0  ;;  %v2054_v32 = vrot.slane %v2045_v42, 4  ;;  %v2031_v46 = vmul.f32 %v2020_v12, %v3984_v26  ;;  %vm4184_vm13 = vmmov %vm4182_vm1 }
 0x81f   :  { %2551 = vmatprep.subr.msk.bf16.mxu0 %vm4170_vm14, %v1857_v52  ;;  %2553 = vmatprep.subr.msk.bf16.mxu1 %vm4171_vm9, %v1859_v55  ;;  %v2033_v56 = vmul.f32 %v2020_v12, %v3989_v29  ;;  %v2083_v34 = vmax.f32 %v2071_v17, 0.0  ;;  %v2085_v20 = vmax.f32 %v2073_v53, 0.0  ;;  %v2082_v3 = vmax.f32 %v2070_v13, 0.0  ;;  %vm4185_vm3 = vmmov %vm4182_vm1 }
 0x820   :  { %1893 = vmatpush1.bf16.msra.mxu0 %v1881_v58  ;;  %1934 = vmatpush1.bf16.msra.mxu1 %v1887_v6  ;;  %v2056_v21 = vsel %vm4177_vm8, %v2054_v32, %v2055_v60  ;;  %v2084_v36 = vmax.f32 %v2072_v25, 0.0  ;;  %vm2128_vm14 = vcmask 162816   ;;  %vm4186_vm9 = vmmov %vm4175_vm0 }
 0x821   :  { %v2066_v48 = vadd.f32 %v2056_v21, %v2030_v18  ;;  %v2068_v31 = vadd.f32 %v2056_v21, %v2032_v49  ;;  %v2067_v55 = vadd.f32 %v2056_v21, %v2031_v46  ;;  %v2069_v6 = vadd.f32 %v2056_v21, %v2033_v56 }
 0x822   :  { %v2095_v33 = vpack.c.bf16 %v2085_v20, %v2085_v20  ;;  %v2092_v35 = vpack.c.bf16 %v2082_v3, %v2082_v3  ;;  %v2094_v37 = vpack.c.bf16 %v2084_v36, %v2084_v36 }
 0x823   :  { %2552 = vmatmul.mubr.msk.bf16.vlgmr.msra.gmra.mrb[28].mxu0 %vm4172_vm7, %v1876_v40  ;;  %2554 = vmatmul.mubr.msk.bf16.vlgmr.msra.gmra.mrb[28].mxu1 %vm4173_vm6, %v1876_v40  ;;  %v2093_v40 = vpack.c.bf16 %v2083_v34, %v2083_v34  ;;  %v2078_v45 = vmax.f32 %v2066_v48, 0.0  ;;  %v2080_v44 = vmax.f32 %v2068_v31, 0.0  ;;  %vm4187_vm7 = vmmov %vm4175_vm0  ;;  %v2241_v31 = vpop.permute.xlu1 %2240 }
 0x824   :  { %2176 = vmatprep.mubr.bf16.mxu0 %v2962_v2  ;;  %2217 = vmatprep.mubr.bf16.mxu1 %v2962_v2  ;;  %vm4188_vm6 = vmmov %vm4175_vm0  ;;  %vm4190_vm0 = vcmask 64512  }
 0x825   :  { %vm4191_vm10 = vmmov %vm4190_vm0 }
 0x8f6   :  { %v1926_v47 = vpop.f32.mrb[28].mxu0  ;;  %v1967_v19 = vpop.f32.mrb[28].mxu1 }
 0x8f7   :  { %v1927_v50 = vadd.f32 %v1926_v47, %v1865_v15  ;;  %v1968_v62 = vadd.f32 %v1967_v19, %v1865_v15  ;;  %v1928_v63 = vpop.f32.mrb[29].mxu0  ;;  %v1969_v5 = vpop.f32.mrb[29].mxu1  ;;  %v2079_v47 = vmax.f32 %v2067_v55, 0.0 }
 0x8f8   :  { %v1929_v7 = vadd.f32 %v1928_v63, %v1865_v15  ;;  %v1970_v28 = vadd.f32 %v1969_v5, %v1865_v15  ;;  %v1930_v39 = vpop.f32.mrb[30].mxu0  ;;  %v1971_v54 = vpop.f32.mrb[30].mxu1 }
 0x8f9   :  { %v1978_v4 = vrot.slane %v1927_v50, 4  ;;  %v1980_v30 = vrot.slane %v1968_v62, 4  ;;  %v1931_v8 = vpop.f32.mrb[31].mxu0  ;;  %v1972_v9 = vpop.f32.mrb[31].mxu1  ;;  %v2081_v50 = vmax.f32 %v2069_v6, 0.0  ;;  %v2119_v54 = vrot.slane %v2094_v37, 2 }
 0x8fa   :  { %v1979_v14 = vrot.slane %v1929_v7, 4  ;;  %v1981_v59 = vrot.slane %v1970_v28, 4  ;;  %v2113_v28 = vrot.slane %v2092_v35, 2  ;;  %v2122_v9 = vrot.slane %v2095_v33, 2 }
 0x8fb   :  { %1986 = vst [vmem:[%s4080_s7] sm:$0xf0] %v1978_v4  ;;  %1988 = vst [vmem:[%s4080_s7 + $0x10] sm:$0xf0] %v1980_v30  ;;  %v2116_v30 = vrot.slane %v2093_v40, 2  ;;  %v2139_v57 = vsel %vm4185_vm3, %v2119_v54, 0 }
 0x8fc   :  { %1987 = vst [vmem:[%s4080_s7 + $0x8] sm:$0xf0] %v1979_v14  ;;  %1989 = vst [vmem:[%s4080_s7 + $0x18] sm:$0xf0] %v1981_v59  ;;  %v2133_v27 = vsel %vm4184_vm13, %v2113_v28, 0 }
 0x902   :  { %v1990_v22 = vld [vmem:[%s4080_s7] sm:$0xf0]  ;;  %v1992_v0 = vld [vmem:[%s4080_s7 + $0x10] sm:$0xf0] }
 0x903   :  { %v1991_v16 = vld [vmem:[%s4080_s7 + $0x8] sm:$0xf0]  ;;  %v1993_v26 = vld [vmem:[%s4080_s7 + $0x18] sm:$0xf0]  ;;  %v2026_v29 = vmul.f32 %v2018_v11, %v1990_v22  ;;  %v2028_v24 = vmul.f32 %v2018_v11, %v1992_v0 }
 0x904   :  { %v2027_v52 = vmul.f32 %v2018_v11, %v1991_v16  ;;  %v2029_v58 = vmul.f32 %v2018_v11, %v1993_v26 }
 0x905   :  { %v2062_v15 = vadd.f32 %v2054_v32, %v2026_v29  ;;  %v2064_v10 = vadd.f32 %v2054_v32, %v2028_v24  ;;  %v2252_v24 = vpop.permute.xlu0 %2251 }
 0x906   :  { %v2063_v38 = vadd.f32 %v2054_v32, %v2027_v52  ;;  %v2065_v42 = vadd.f32 %v2054_v32, %v2029_v58 }
 0x907   :  { %v2074_v51 = vmax.f32 %v2062_v15, 0.0  ;;  %v2076_v41 = vmax.f32 %v2064_v10, 0.0 }
 0x908   :  { %v2075_v60 = vmax.f32 %v2063_v38, 0.0  ;;  %v2077_v19 = vmax.f32 %v2065_v42, 0.0 }
 0x909   :  { %v2088_v62 = vpack.c.bf16 %v2078_v45, %v2074_v51  ;;  %v2090_v63 = vpack.c.bf16 %v2080_v44, %v2076_v41 }
 0x90a   :  { %v2089_v5 = vpack.c.bf16 %v2079_v47, %v2075_v60  ;;  %v2091_v61 = vpack.c.bf16 %v2081_v50, %v2077_v19 }
 0x90b   :  { %v2112_v7 = vrot.slane %v2088_v62, 2  ;;  %v2118_v39 = vrot.slane %v2090_v63, 2 }
 0x90c   :  { %v2115_v4 = vrot.slane %v2089_v5, 2  ;;  %v2121_v8 = vrot.slane %v2091_v61, 2 }
 0x90d   :  { %v2114_v11 = vsel %vm4178_vm2, %v2112_v7, %v2113_v28  ;;  %v2120_v23 = vsel %vm4179_vm5, %v2118_v39, %v2119_v54 }
 0x90e   :  { %v2117_v14 = vsel %vm4180_vm12, %v2115_v4, %v2116_v30  ;;  %v2123_v59 = vsel %vm4181_vm11, %v2121_v8, %v2122_v9 }
 0x90f   :  { %2144 = vmatprep.subr.bf16.mxu0 %v2117_v14  ;;  %2185 = vmatprep.subr.bf16.mxu1 %v2123_v59 }
 0x910   :  { %2145 = vmatpush1.bf16.msra.mxu0 %v2114_v11  ;;  %2186 = vmatpush1.bf16.msra.mxu1 %v2120_v23 }
 0x911   :  { %2563 = vmatprep.subr.msk.bf16.mxu0 %vm4182_vm1, %v2116_v30  ;;  %2565 = vmatprep.subr.msk.bf16.mxu1 %vm4183_vm4, %v2122_v9 }
 0x914   :  { %2147 = vmatpush1.bf16.msra.mxu0 %v2133_v27  ;;  %2188 = vmatpush1.bf16.msra.mxu1 %v2139_v57 }
 0x917   :  { %2564 = vmatmul.mubr.msk.bf16.vlgmr.msra.gmra.mrb[32].mxu0 %vm2128_vm14, %v2561_v43  ;;  %2566 = vmatmul.mubr.msk.bf16.vlgmr.msra.gmra.mrb[32].mxu1 %vm2128_vm14, %v2561_v43 }
 0x918   :  { %2300 = vmatprep.mubr.bf16.mxu0 %v2962_v2  ;;  %2341 = vmatprep.mubr.bf16.mxu1 %v2962_v2 }
 0x9ea   :  { %v2178_v17 = vpop.f32.mrb[32].mxu0  ;;  %v2219_v53 = vpop.f32.mrb[32].mxu1 }
 0x9eb   :  { %v2179_v12 = vadd.f32 %v2178_v17, %v2101_v1  ;;  %v2220_v13 = vadd.f32 %v2219_v53, %v2101_v1  ;;  %v2180_v25 = vpop.f32.mrb[33].mxu0  ;;  %v2221_v18 = vpop.f32.mrb[33].mxu1 }
 0x9ec   :  { %v2181_v49 = vadd.f32 %v2180_v25, %v2101_v1  ;;  %v2222_v32 = vadd.f32 %v2221_v18, %v2101_v1  ;;  %v2182_v46 = vpop.f32.mrb[34].mxu0  ;;  %v2223_v56 = vpop.f32.mrb[34].mxu1 }
 0x9ed   :  { %v2226_v34 = vmax.f32 %v2179_v12, 0.0  ;;  %v2228_v20 = vmax.f32 %v2220_v13, 0.0  ;;  %v2183_v21 = vpop.f32.mrb[35].mxu0  ;;  %v2224_v22 = vpop.f32.mrb[35].mxu1 }
 0x9ee   :  { %v2227_v3 = vmax.f32 %v2181_v49, 0.0  ;;  %v2229_v0 = vmax.f32 %v2222_v32, 0.0 }
 0x9ef   :  { %v2232_v36 = vpack.c.bf16 %v2226_v34, %v2226_v34  ;;  %v2234_v16 = vpack.c.bf16 %v2228_v20, %v2228_v20 }
 0x9f0   :  { %v2233_v2 = vpack.c.bf16 %v2227_v3, %v2227_v3  ;;  %v2235_v26 = vpack.c.bf16 %v2229_v0, %v2229_v0 }
 0x9f1   :  { %v2257_v29 = vsel %vm4186_vm9, %v2232_v36, 0  ;;  %v2263_v48 = vsel %vm4187_vm7, %v2234_v16, 0 }
 0x9f2   :  { %2570 = vmatprep.subr.msk.bf16.mxu0 %vm4188_vm6, %v2233_v2  ;;  %2572 = vmatprep.subr.msk.bf16.mxu1 %vm4189_vm15, %v2235_v26 }
 0x9f3   :  { %2269 = vmatpush1.bf16.msra.mxu0 %v2257_v29  ;;  %2310 = vmatpush1.bf16.msra.mxu1 %v2263_v48 }
 0x9f6   :  { %2571 = vmatmul.mubr.msk.bf16.vlgmr.msra.gmra.mrb[36].mxu0 %vm4190_vm0, %v2252_v24  ;;  %2573 = vmatmul.mubr.msk.bf16.vlgmr.msra.gmra.mrb[36].mxu1 %vm4191_vm10, %v2252_v24 }
 0xac9   :  { %v2302_v52 = vpop.f32.mrb[36].mxu0  ;;  %v2343_v55 = vpop.f32.mrb[36].mxu1 }
 0xaca   :  { %v2303_v58 = vadd.f32 %v2302_v52, %v2241_v31  ;;  %v2344_v6 = vadd.f32 %v2343_v55, %v2241_v31  ;;  %v2304_v40 = vpop.f32.mrb[37].mxu0  ;;  %v2345_v33 = vpop.f32.mrb[37].mxu1 }
 0xacb   :  { %v2305_v15 = vadd.f32 %v2304_v40, %v2241_v31  ;;  %v2346_v10 = vadd.f32 %v2345_v33, %v2241_v31  ;;  %v2306_v38 = vpop.f32.mrb[38].mxu0  ;;  %v2347_v42 = vpop.f32.mrb[38].mxu1 }
 0xacc   :  { %2350 = vst [vmem:[%s4080_s7] sm:$0xf] %v2303_v58  ;;  %2352 = vst [vmem:[%s4080_s7 + $0x10] sm:$0xf] %v2344_v6  ;;  %v2307_v35 = vpop.f32.mrb[39].mxu0  ;;  %v2348_v37 = vpop.f32.mrb[39].mxu1 }
 0xacd   :  { %2351 = vst [vmem:[%s4080_s7 + $0x8] sm:$0xf] %v2305_v15  ;;  %2353 = vst [vmem:[%s4080_s7 + $0x18] sm:$0xf] %v2346_v10 }

</bundles_post_ra>
